<compile_context>
chip_gen: v7x
topology: tpu7x:2x2x1
jax: 0.10.0
libtpu: 0.0.40
codegen_flags: <defaults>
</compile_context>

<pallas_src>
import jax
import jax.numpy as jnp
from jax import lax
from jax.experimental import pallas as pl
from jax.experimental.pallas import tpu as pltpu


_LANE = 128       # TPU lane width / MXU N alignment (also v5e MXU height)
_ROW_CAP = 1024   # batch-tile cap: ~512-1024 rows already saturates HBM BW


def _round_up(x, n):
    return ((x + n - 1) // n) * n


def _tpu_generation():
    """(tensorcores_per_chip, physical_vmem_bytes) from the device kind."""
    kind = ""
    try:
        kind = jax.devices()[0].device_kind.lower()
    except Exception:
        pass
    if "v7" in kind or "tpu7" in kind:
        return 2, 64 << 20            # v7x: 2 TCs/chip, 64 MiB VMEM per TC
    if "v6" in kind or "v5" in kind or "v4" in kind:
        return 1, 128 << 20           # v4/v5e/v6e: 1 TC, 128 MiB VMEM
    return 1, 64 << 20                # unknown: conservative defaults


def _choose_tile_m(m, num_tc):
    # Tiny batches / single-TC chips: one full-batch block (extra grid steps
    # buy no overlap when compute is this small).
    if m <= _ROW_CAP and (num_tc <= 1 or m < 2 * _LANE):
        return m
    # Otherwise tile in multiples of 128 (lane/MXU aligned), capped at the
    # HBM-roofline sweet spot, and small enough that every TensorCore gets at
    # least one grid step (v7x megacore).
    per_core = pl.cdiv(m, num_tc)
    return min(_ROW_CAP, max(_LANE, (per_core // _LANE) * _LANE))


def _vmem_estimate(tile_m, n_0, n1p, n2p, n_3, out_block_bytes):
    """Honest per-step VMEM working set (bytes)."""
    per_row = (2 * n_0 * 4            # double-buffered f32 x rows
               + n_0 * 2              # in-kernel bf16 copy of the x tile
               + n1p * 4 + n1p * 2    # h1 (f32) + bf16 repack of h1
               + n2p * 4)             # h2 (f32)
    weights = (n_0 * n1p * 2 + n1p * n2p * 2          # bf16 w1^T, w2^T
               + n2p * max(n_3, 8) * 4                # w3 (f32, sublane-padded)
               + (n1p + n2p + _round_up(n_3, _LANE)) * 4)   # biases
    return tile_m * per_row + 2 * out_block_bytes + 2 * weights


def _mlp_body(x_ref, w1_ref, b1_ref, w2_ref, b2_ref):
    x = x_ref[...].astype(w1_ref.dtype)                       # f32 -> bf16 (VPU)
    h1 = jnp.dot(x, w1_ref[...],
                 preferred_element_type=jnp.float32) + b1_ref[...]
    h1 = jnp.maximum(h1, 0.0)
    h2 = jnp.dot(h1.astype(w2_ref.dtype), w2_ref[...],
                 preferred_element_type=jnp.float32) + b2_ref[...]
    return jnp.maximum(h2, 0.0)                                # (TM, n2p) f32


def _mlp_head1_kernel(x_ref, w1_ref, b1_ref, w2_ref, b2_ref, w3_ref, b3_ref,
                      o_ref):
    """n_3 == 1: produce logits directly as a lane-dense (1, TM) row."""
    h2 = _mlp_body(x_ref, w1_ref, b1_ref, w2_ref, b2_ref)
    # (1, n2p) x (TM, n2p)^T -> (1, TM); scalar bias from SMEM.
    logits = lax.dot_general(w3_ref[...], h2, (((1,), (1,)), ((), ())),
                             preferred_element_type=jnp.float32) + b3_ref[0, 0]
    o_ref[...] = jax.nn.sigmoid(logits).astype(o_ref.dtype)


def _mlp_kernel(x_ref, w1_ref, b1_ref, w2_ref, b2_ref, w3_ref, b3_ref, o_ref):
    """General n_3 > 1 fallback: standard (TM, n_3) output tile."""
    h2 = _mlp_body(x_ref, w1_ref, b1_ref, w2_ref, b2_ref)
    logits = jnp.dot(h2, w3_ref[...],
                     preferred_element_type=jnp.float32) + b3_ref[...]
    o_ref[...] = jax.nn.sigmoid(logits).astype(o_ref.dtype)


def torch_model3_forward(x, params, *, tile_m=None):
    """Fused forward of TorchModel3.

    params = (w1, b1, w2, b2, w3, b3) with nn.Linear layout: w_i is
    (out_features, in_features).  Returns sigmoid(L3(relu(L2(relu(L1(x)))))).
    """
    w1, b1, w2, b2, w3, b3 = params
    m, n_0 = x.shape
    n_1, n_2, n_3 = w1.shape[0], w2.shape[0], w3.shape[0]
    n1p, n2p = _round_up(n_1, _LANE), _round_up(n_2, _LANE)
    head1 = (n_3 == 1)

    num_tc, phys_vmem = _tpu_generation()

    # ---- batch tile --------------------------------------------------------
    if tile_m is None:
        tile_m = _choose_tile_m(m, num_tc)
    if tile_m >= m:
        tile_m = m                                      # one full-batch block
    else:
        tile_m = max(_LANE, (tile_m // _LANE) * _LANE)  # lane / MXU aligned
        tile_m = min(tile_m, m)
    grid_m = pl.cdiv(m, tile_m)

    # ---- host-side one-time weight prep: pad hidden dims to 128 (exact,
    #      zeros) and pre-transpose to (in, out) layout. ---------------------
    x_f32 = x.astype(jnp.float32)                       # cast to bf16 happens in-kernel
    w1t = jnp.pad(w1.astype(jnp.bfloat16).T, ((0, 0), (0, n1p - n_1)))
    b1p = jnp.pad(b1.astype(jnp.float32), (0, n1p - n_1)).reshape(1, n1p)
    w2t = jnp.pad(w2.astype(jnp.bfloat16).T, ((0, n1p - n_1), (0, n2p - n_2)))
    b2p = jnp.pad(b2.astype(jnp.float32), (0, n2p - n_2)).reshape(1, n2p)

    if head1:
        w3_arg = jnp.pad(w3.astype(jnp.float32), ((0, 0), (0, n2p - n_2)))  # (1, n2p)
        b3_arg = b3.astype(jnp.float32).reshape(1, 1)                       # SMEM scalar
        w3_spec = pl.BlockSpec((1, n2p), lambda i: (0, 0))
        b3_spec = pl.BlockSpec(memory_space=pltpu.MemorySpace.SMEM)
        out_shape = jax.ShapeDtypeStruct((1, m), jnp.float32)               # lane-dense
        out_spec = pl.BlockSpec((1, tile_m), lambda i: (0, i))
        out_block_bytes = 8 * tile_m * 4
        kernel = _mlp_head1_kernel
    else:
        w3_arg = jnp.pad(w3.astype(jnp.float32).T, ((0, n2p - n_2), (0, 0)))  # (n2p, n_3)
        b3_arg = b3.astype(jnp.float32).reshape(1, n_3)
        w3_spec = pl.BlockSpec((n2p, n_3), lambda i: (0, 0))
        b3_spec = pl.BlockSpec((1, n_3), lambda i: (0, 0))
        out_shape = jax.ShapeDtypeStruct((m, n_3), jnp.float32)
        out_spec = pl.BlockSpec((tile_m, n_3), lambda i: (i, 0))
        out_block_bytes = tile_m * _round_up(n_3, _LANE) * 4
        kernel = _mlp_kernel

    est = _vmem_estimate(tile_m, n_0, n1p, n2p, n_3, out_block_bytes)
    vmem_limit = min(max(32 << 20, int(1.5 * est)), phys_vmem - (8 << 20))

    flops = 2 * m * (n_0 * n1p + n1p * n2p + n2p * n_3) \
        + 4 * m * (n1p + n2p + n_3)
    bytes_accessed = (m * n_0 * 4                       # x (f32)
                      + n_0 * n1p * 2 + n1p * n2p * 2   # bf16 weights
                      + n2p * max(n_3, 1) * 4           # w3
                      + (n1p + n2p + n_3) * 4           # biases
                      + m * n_3 * 4)                    # output
    cost = pl.CostEstimate(flops=flops, transcendentals=m * n_3,
                           bytes_accessed=bytes_accessed)

    out = pl.pallas_call(
        kernel,
        out_shape=out_shape,
        grid=(grid_m,),
        in_specs=[
            pl.BlockSpec((tile_m, n_0), lambda i: (i, 0)),   # x: f32, batch-tiled
            pl.BlockSpec((n_0, n1p), lambda i: (0, 0)),      # w1^T: bf16, VMEM-resident
            pl.BlockSpec((1, n1p), lambda i: (0, 0)),        # b1
            pl.BlockSpec((n1p, n2p), lambda i: (0, 0)),      # w2^T: bf16, VMEM-resident
            pl.BlockSpec((1, n2p), lambda i: (0, 0)),        # b2
            w3_spec,                                         # w3 row / w3^T
            b3_spec,                                         # b3 (SMEM scalar if n_3==1)
        ],
        out_specs=out_spec,
        compiler_params=pltpu.CompilerParams(
            dimension_semantics=("parallel",),               # megacore sharding on v7x
            vmem_limit_bytes=int(vmem_limit)),
        cost_estimate=cost,
    )(x_f32, w1t, b1p, w2t, b2p, w3_arg, b3_arg)

    if head1:
        return out.reshape(m, 1)      # (1, m) row -> (m, 1): pure metadata reshape
    return out


def init_params(key, n_0, n_1, n_2, n_3):
    """Deterministic init mimicking nn.Linear default (uniform +-1/sqrt(fan_in))."""
    ks = jax.random.split(key, 6)

    def linear(kw, kb, fan_in, fan_out):
        bound = 1.0 / jnp.sqrt(fan_in)
        w = jax.random.uniform(kw, (fan_out, fan_in), jnp.float32, -bound, bound)
        b = jax.random.uniform(kb, (fan_out,), jnp.float32, -bound, bound)
        return w, b

    w1, b1 = linear(ks[0], ks[1], n_0, n_1)
    w2, b2 = linear(ks[2], ks[3], n_1, n_2)
    w3, b3 = linear(ks[4], ks[5], n_2, n_3)
    return (w1, b1, w2, b2, w3, b3)


if __name__ == "__main__":
    # Feature dims from the module (n_0=1000, n_1=100, n_2=100, n_3=1).
    # Batch m=256 so the forced-tiled call exercises the multi-step pipelined,
    # weight-resident path (grid=(2,)) on every chip generation.
    m, n_0, n_1, n_2, n_3 = 256, 1000, 100, 100, 1

    key = jax.random.PRNGKey(0)
    kx, kp = jax.random.split(key)
    x = jax.random.normal(kx, (m, n_0), dtype=jnp.float32)
    x = (x - jnp.mean(x)) / jnp.std(x)            # same normalization as trainer()

    params = init_params(kp, n_0, n_1, n_2, n_3)

    out_auto = torch_model3_forward(x, params)              # chip-tuned tiling
    out_tiled = torch_model3_forward(x, params, tile_m=128)  # forced grid=(2,)
    jax.block_until_ready((out_auto, out_tiled))

    # Reference in plain f32 JAX (same math as the PyTorch forward).
    w1, b1, w2, b2, w3, b3 = params
    h = jnp.maximum(x @ w1.T + b1, 0.0)
    h = jnp.maximum(h @ w2.T + b2, 0.0)
    ref = jax.nn.sigmoid(h @ w3.T + b3)

    assert out_auto.shape == (m, n_3) and out_tiled.shape == (m, n_3)
    # bf16 MXU operands with f32 accumulation -> relaxed tolerance vs f32 ref.
    assert jnp.allclose(out_auto, ref, atol=2e-2, rtol=2e-2), "auto-tile mismatch"
    assert jnp.allclose(out_tiled, ref, atol=2e-2, rtol=2e-2), "forced-tile mismatch"

    print("KERNEL_OK")
</pallas_src>

<mosaic_0001>
module attributes {stable_mosaic.version = 11 : i64} {
  func.func @_mlp_head1_kernel(%arg0: i32, %arg1: memref<256x1000xf32, #tpu.memory_space<vmem>>, %arg2: memref<1000x128xbf16, #tpu.memory_space<vmem>>, %arg3: memref<1x128xf32, #tpu.memory_space<vmem>>, %arg4: memref<128x128xbf16, #tpu.memory_space<vmem>>, %arg5: memref<1x128xf32, #tpu.memory_space<vmem>>, %arg6: memref<1x128xf32, #tpu.memory_space<vmem>>, %arg7: memref<1x1xf32, #tpu.memory_space<smem>>, %arg8: memref<1x256xf32, #tpu.memory_space<vmem>>) attributes {dimension_semantics = [#tpu.dimension_semantics<parallel>], iteration_bounds = array<i64: 1>, scalar_prefetch = 0 : i64, scratch_operands = 0 : i64, tpu.core_type = #tpu.core_type<tc>, window_params = [{transform_indices = @transform_0, window_bounds = array<i64: 256, 1000>}, {pipeline_mode = #tpu.pipeline_mode<synchronous>, transform_indices = @transform_1, window_bounds = array<i64: 1000, 128>}, {pipeline_mode = #tpu.pipeline_mode<synchronous>, transform_indices = @transform_2, window_bounds = array<i64: 1, 128>}, {pipeline_mode = #tpu.pipeline_mode<synchronous>, transform_indices = @transform_3, window_bounds = array<i64: 128, 128>}, {pipeline_mode = #tpu.pipeline_mode<synchronous>, transform_indices = @transform_4, window_bounds = array<i64: 1, 128>}, {pipeline_mode = #tpu.pipeline_mode<synchronous>, transform_indices = @transform_5, window_bounds = array<i64: 1, 128>}, {transform_indices = @transform_6, window_bounds = array<i64: 1, 1>}, {transform_indices = @transform_7, window_bounds = array<i64: 1, 256>}]} {
    %c0 = arith.constant 0 : index
    %c0_0 = arith.constant 0 : index
    %0 = vector.load %arg1[%c0, %c0_0] : memref<256x1000xf32, #tpu.memory_space<vmem>>, vector<256x1000xf32>
    %1 = arith.truncf %0 : vector<256x1000xf32> to vector<256x1000xbf16>
    %c0_1 = arith.constant 0 : index
    %c0_2 = arith.constant 0 : index
    %2 = vector.load %arg2[%c0_1, %c0_2] : memref<1000x128xbf16, #tpu.memory_space<vmem>>, vector<1000x128xbf16>
    %cst = arith.constant dense<0.000000e+00> : vector<256x128xf32>
    %3 = tpu.matmul %1, %2, %cst {dimension_numbers = #tpu.dot_dimension_numbers<[1], [0], [0], [1], [0, 0, 1, 1], [], []>} : vector<256x1000xbf16>, vector<1000x128xbf16>, vector<256x128xf32> -> vector<256x128xf32>
    %c0_3 = arith.constant 0 : index
    %c0_4 = arith.constant 0 : index
    %4 = vector.load %arg3[%c0_3, %c0_4] : memref<1x128xf32, #tpu.memory_space<vmem>>, vector<1x128xf32>
    %5 = vector.broadcast %4 : vector<1x128xf32> to vector<256x128xf32>
    %6 = arith.addf %3, %5 : vector<256x128xf32>
    %cst_5 = arith.constant 0.000000e+00 : f32
    %7 = vector.broadcast %cst_5 : f32 to vector<256x128xf32>
    %8 = arith.maximumf %6, %7 : vector<256x128xf32>
    %9 = arith.truncf %8 : vector<256x128xf32> to vector<256x128xbf16>
    %c0_6 = arith.constant 0 : index
    %c0_7 = arith.constant 0 : index
    %10 = vector.load %arg4[%c0_6, %c0_7] : memref<128x128xbf16, #tpu.memory_space<vmem>>, vector<128x128xbf16>
    %cst_8 = arith.constant dense<0.000000e+00> : vector<256x128xf32>
    %11 = tpu.matmul %9, %10, %cst_8 {dimension_numbers = #tpu.dot_dimension_numbers<[1], [0], [0], [1], [0, 0, 1, 1], [], []>} : vector<256x128xbf16>, vector<128x128xbf16>, vector<256x128xf32> -> vector<256x128xf32>
    %c0_9 = arith.constant 0 : index
    %c0_10 = arith.constant 0 : index
    %12 = vector.load %arg5[%c0_9, %c0_10] : memref<1x128xf32, #tpu.memory_space<vmem>>, vector<1x128xf32>
    %13 = vector.broadcast %12 : vector<1x128xf32> to vector<256x128xf32>
    %14 = arith.addf %11, %13 : vector<256x128xf32>
    %cst_11 = arith.constant 0.000000e+00 : f32
    %15 = vector.broadcast %cst_11 : f32 to vector<256x128xf32>
    %16 = arith.maximumf %14, %15 : vector<256x128xf32>
    %c0_12 = arith.constant 0 : index
    %c0_13 = arith.constant 0 : index
    %17 = vector.load %arg6[%c0_12, %c0_13] : memref<1x128xf32, #tpu.memory_space<vmem>>, vector<1x128xf32>
    %cst_14 = arith.constant dense<0.000000e+00> : vector<1x256xf32>
    %18 = tpu.matmul %17, %16, %cst_14 {dimension_numbers = #tpu.dot_dimension_numbers<[1], [1], [0], [0], [0, 0, 1, 0], [], []>} : vector<1x128xf32>, vector<256x128xf32>, vector<1x256xf32> -> vector<1x256xf32>
    %c0_15 = arith.constant 0 : index
    %c0_16 = arith.constant 0 : index
    %19 = memref.load %arg7[%c0_15, %c0_16] : memref<1x1xf32, #tpu.memory_space<smem>>
    %20 = vector.broadcast %19 : f32 to vector<1x256xf32>
    %21 = arith.addf %18, %20 : vector<1x256xf32>
    %22 = arith.negf %21 : vector<1x256xf32>
    %23 = math.exp %22 : vector<1x256xf32>
    %cst_17 = arith.constant 1.000000e+00 : f32
    %24 = vector.broadcast %cst_17 : f32 to vector<1x256xf32>
    %25 = arith.addf %24, %23 : vector<1x256xf32>
    %26 = arith.divf %24, %25 : vector<1x256xf32>
    %c0_18 = arith.constant 0 : index
    %c0_19 = arith.constant 0 : index
    %27 = vector.load %arg8[%c0_18, %c0_19] : memref<1x256xf32, #tpu.memory_space<vmem>>, vector<1x256xf32>
    tpu.vector_store %arg8[%c0_18, %c0_19], %26 {strides = array<i32>} : memref<1x256xf32, #tpu.memory_space<vmem>>, vector<1x256xf32>,
    return
  }
  func.func @transform_0(%arg0: i32) -> (i32, i32) {
    %c0_i32 = arith.constant 0 : i32
    %c0_i32_0 = arith.constant 0 : i32
    return %arg0, %c0_i32 : i32, i32
  }
  func.func @transform_1(%arg0: i32) -> (i32, i32) {
    %c0_i32 = arith.constant 0 : i32
    %c0_i32_0 = arith.constant 0 : i32
    %c0_i32_1 = arith.constant 0 : i32
    return %c0_i32, %c0_i32_0 : i32, i32
  }
  func.func @transform_2(%arg0: i32) -> (i32, i32) {
    %c0_i32 = arith.constant 0 : i32
    %c0_i32_0 = arith.constant 0 : i32
    %c0_i32_1 = arith.constant 0 : i32
    return %c0_i32, %c0_i32_0 : i32, i32
  }
  func.func @transform_3(%arg0: i32) -> (i32, i32) {
    %c0_i32 = arith.constant 0 : i32
    %c0_i32_0 = arith.constant 0 : i32
    %c0_i32_1 = arith.constant 0 : i32
    return %c0_i32, %c0_i32_0 : i32, i32
  }
  func.func @transform_4(%arg0: i32) -> (i32, i32) {
    %c0_i32 = arith.constant 0 : i32
    %c0_i32_0 = arith.constant 0 : i32
    %c0_i32_1 = arith.constant 0 : i32
    return %c0_i32, %c0_i32_0 : i32, i32
  }
  func.func @transform_5(%arg0: i32) -> (i32, i32) {
    %c0_i32 = arith.constant 0 : i32
    %c0_i32_0 = arith.constant 0 : i32
    %c0_i32_1 = arith.constant 0 : i32
    return %c0_i32, %c0_i32_0 : i32, i32
  }
  func.func @transform_6(%arg0: i32) -> (i32, i32) {
    %c0_i32 = arith.constant 0 : i32
    %c0_i32_0 = arith.constant 0 : i32
    %c0_i32_1 = arith.constant 0 : i32
    return %c0_i32, %c0_i32_0 : i32, i32
  }
  func.func @transform_7(%arg0: i32) -> (i32, i32) {
    %c0_i32 = arith.constant 0 : i32
    %c0_i32_0 = arith.constant 0 : i32
    return %c0_i32, %arg0 : i32, i32
  }
}

</mosaic_0001>

<bundles_post_ra>
// kernel: tpu_custom_call.1
= control target key start
LH: loop header
LB: loop body
LE: loop exit
PB: predicated region body
PF: predicated region fallthrough
CT: control target
= control target key end

     0   :  { %v2723_v46 = vmov 0   ;;  %vm969_vm0 = vcmask 1043456   ;;  %s3988_s0 = inlined_call_operand.vmem [shape: f32[256,1000], index: 0, kind: input, shape index: {}]   ;;  %s3989_s1 = inlined_call_operand.vmem [shape: bf16[1000,128], index: 1, kind: input, shape index: {}]   ;;  %s3990_s2 = inlined_call_operand.vmem [shape: f32[1,128], index: 2, kind: input, shape index: {}]   ;;  %s3991_s3 = inlined_call_operand.vmem [shape: bf16[128,128], index: 3, kind: input, shape index: {}]   ;;  %s3992_s4 = inlined_call_operand.vmem [shape: f32[1,128], index: 4, kind: input, shape index: {}]   ;;  %s3993_s5 = inlined_call_operand.vmem [shape: f32[1,128], index: 5, kind: input, shape index: {}]   ;;  %s3994_s6 = inlined_call_operand.<no memory space> [shape: f32[1,1], index: 6, kind: input, shape index: {}]   ;;  %s3995_s7 = inlined_call_operand.hbm [shape: f32[1,256], index: 7, kind: output, shape index: {}]  }
   0x1   :  { %v2620_v0 = vld [vmem:[%s3989_s1 + $0x40] sm:$0xff]   ;;  %v2624_v4 = vld [vmem:[%s3989_s1 + $0x48] sm:$0xff]   ;;  %v2628_v8 = vld [vmem:[%s3989_s1 + $0x50] sm:$0xff]  }
   0x2   :  { %v2621_v1 = vld [vmem:[%s3989_s1] sm:$0xff]   ;;  %2143 = vmatprep.subr.bf16.mxu0 %v2620_v0  ;;  %v2625_v5 = vld [vmem:[%s3989_s1 + $0x8] sm:$0xff]   ;;  %v2629_v9 = vld [vmem:[%s3989_s1 + $0x10] sm:$0xff]  }
   0x3   :  { %v2622_v2 = vld [vmem:[%s3989_s1 + $0xc0] sm:$0xff]   ;;  %2144 = vmatpush3.bf16.msra.mxu0 %v2621_v1  ;;  %v2626_v6 = vld [vmem:[%s3989_s1 + $0xc8] sm:$0xff]   ;;  %v2630_v10 = vld [vmem:[%s3989_s1 + $0xd0] sm:$0xff]  }
   0x4   :  { %v2623_v3 = vld [vmem:[%s3989_s1 + $0x80] sm:$0xff]   ;;  %2255 = vmatprep.subr.bf16.mxu1 %v2622_v2  ;;  %2145 = vmatprep.subr.bf16.mxu0 %v2624_v4  ;;  %v2627_v7 = vld [vmem:[%s3989_s1 + $0x88] sm:$0xff]   ;;  %v2631_v11 = vld [vmem:[%s3989_s1 + $0x90] sm:$0xff]  }
   0x5   :  { %2256 = vmatpush3.bf16.msra.mxu1 %v2623_v3  ;;  %v2632_v12 = vld [vmem:[%s3989_s1 + $0x58] sm:$0xff]   ;;  %v2636_v16 = vld [vmem:[%s3989_s1 + $0x60] sm:$0xff]   ;;  %v2640_v20 = vld [vmem:[%s3989_s1 + $0x68] sm:$0xff]  }
   0x6   :  { %2257 = vmatprep.subr.bf16.mxu1 %v2626_v6  ;;  %v2633_v13 = vld [vmem:[%s3989_s1 + $0x18] sm:$0xff]   ;;  %v2637_v17 = vld [vmem:[%s3989_s1 + $0x20] sm:$0xff]   ;;  %v2641_v21 = vld [vmem:[%s3989_s1 + $0x28] sm:$0xff]  }
   0x7   :  { %2146 = vmatpush3.bf16.msra.mxu0 %v2625_v5  ;;  %v2634_v14 = vld [vmem:[%s3989_s1 + $0xd8] sm:$0xff]   ;;  %v2638_v18 = vld [vmem:[%s3989_s1 + $0xe0] sm:$0xff]   ;;  %v2642_v22 = vld [vmem:[%s3989_s1 + $0xe8] sm:$0xff]  }
   0x8   :  { %2147 = vmatprep.subr.bf16.mxu0 %v2628_v8  ;;  %v2635_v15 = vld [vmem:[%s3989_s1 + $0x98] sm:$0xff]   ;;  %v2639_v19 = vld [vmem:[%s3989_s1 + $0xa0] sm:$0xff]   ;;  %v2643_v23 = vld [vmem:[%s3989_s1 + $0xa8] sm:$0xff]  }
   0x9   :  { %2258 = vmatpush3.bf16.msra.mxu1 %v2627_v7  ;;  %v2644_v24 = vld [vmem:[%s3989_s1 + $0x70] sm:$0xff]   ;;  %v2648_v28 = vld [vmem:[%s3989_s1 + $0x78] sm:$0xff]   ;;  %v30_v31 = vld [vmem:[%s3988_s0 + $0x8] sm:$0xff] }
   0xa   :  { %2259 = vmatprep.subr.bf16.mxu1 %v2630_v10  ;;  %v2645_v25 = vld [vmem:[%s3989_s1 + $0x30] sm:$0xff]   ;;  %v2649_v29 = vld [vmem:[%s3989_s1 + $0x38] sm:$0xff]   ;;  %v38_v32 = vld [vmem:[%s3988_s0 + $0x48] sm:$0xff] }
   0xb   :  { %2148 = vmatpush3.bf16.msra.mxu0 %v2629_v9  ;;  %v2646_v26 = vld [vmem:[%s3989_s1 + $0xf0] sm:$0xff]   ;;  %v2650_v30 = vld [vmem:[%s3989_s1 + $0xf8] sm:$0xff]   ;;  %v286_v33 = vpack.c.bf16 %v38_v32, %v30_v31  ;;  %v29_v35 = vld [vmem:[%s3988_s0] sm:$0xff] }
   0xc   :  { %2149 = vmatprep.subr.bf16.mxu0 %v2632_v12  ;;  %v2647_v27 = vld [vmem:[%s3989_s1 + $0xb0] sm:$0xff]   ;;  %v2651_v34 = vld [vmem:[%s3989_s1 + $0xb8] sm:$0xff]   ;;  %v37_v36 = vld [vmem:[%s3988_s0 + $0x40] sm:$0xff] }
   0xd   :  { %2260 = vmatpush3.bf16.msra.mxu1 %v2631_v11  ;;  %v32_v37 = vld [vmem:[%s3988_s0 + $0x18] sm:$0xff]  ;;  %1005 = vmatprep.mubr.bf16.mxu0 %v286_v33  ;;  %v285_v39 = vpack.c.bf16 %v37_v36, %v29_v35  ;;  %v31_v41 = vld [vmem:[%s3988_s0 + $0x10] sm:$0xff]  ;;  %v46_v43 = vld [vmem:[%s3988_s0 + $0x88] sm:$0xff] }
   0xe   :  { %2261 = vmatprep.subr.bf16.mxu1 %v2634_v14  ;;  %v40_v38 = vld [vmem:[%s3988_s0 + $0x58] sm:$0xff]  ;;  %v39_v42 = vld [vmem:[%s3988_s0 + $0x50] sm:$0xff]  ;;  %v54_v45 = vld [vmem:[%s3988_s0 + $0xc8] sm:$0xff] }
   0xf   :  { %2150 = vmatpush3.bf16.msra.mxu0 %v2633_v13  ;;  %v288_v40 = vpack.c.bf16 %v40_v38, %v32_v37  ;;  %v287_v44 = vpack.c.bf16 %v39_v42, %v31_v41  ;;  %v294_v47 = vpack.c.bf16 %v54_v45, %v46_v43  ;;  %v48_v48 = vld [vmem:[%s3988_s0 + $0x98] sm:$0xff]  ;;  %v45_v50 = vld [vmem:[%s3988_s0 + $0x80] sm:$0xff]  ;;  %v47_v53 = vld [vmem:[%s3988_s0 + $0x90] sm:$0xff] }
  0x10   :  { %2151 = vmatprep.subr.bf16.mxu0 %v2636_v16  ;;  %v56_v49 = vld [vmem:[%s3988_s0 + $0xd8] sm:$0xff]  ;;  %v53_v51 = vld [vmem:[%s3988_s0 + $0xc0] sm:$0xff]  ;;  %v55_v54 = vld [vmem:[%s3988_s0 + $0xd0] sm:$0xff] }
  0x11   :  { %2262 = vmatpush3.bf16.msra.mxu1 %v2635_v15  ;;  %1166 = vmatprep.mubr.bf16.mxu1 %v288_v40  ;;  %v296_v52 = vpack.c.bf16 %v56_v49, %v48_v48  ;;  %v62_v55 = vld [vmem:[%s3988_s0 + $0x108] sm:$0xff]  ;;  %v64_v57 = vld [vmem:[%s3988_s0 + $0x118] sm:$0xff]  ;;  %v293_v59 = vpack.c.bf16 %v53_v51, %v45_v50  ;;  %v295_v60 = vpack.c.bf16 %v55_v54, %v47_v53  ;;  %v61_v63 = vld [vmem:[%s3988_s0 + $0x100] sm:$0xff] }
  0x12   :  { %2263 = vmatprep.subr.bf16.mxu1 %v2638_v18  ;;  %v70_v56 = vld [vmem:[%s3988_s0 + $0x148] sm:$0xff]  ;;  %v72_v58 = vld [vmem:[%s3988_s0 + $0x158] sm:$0xff]  ;;  %v69_v0 = vld [vmem:[%s3988_s0 + $0x140] sm:$0xff] }
  0x13   :  { %2152 = vmatpush3.bf16.msra.mxu0 %v2637_v17  ;;  %v302_v61 = vpack.c.bf16 %v70_v56, %v62_v55  ;;  %v304_v62 = vpack.c.bf16 %v72_v58, %v64_v57  ;;  %v63_v1 = vld [vmem:[%s3988_s0 + $0x110] sm:$0xff]  ;;  %v78_v3 = vld [vmem:[%s3988_s0 + $0x188] sm:$0xff]  ;;  %v80_v5 = vld [vmem:[%s3988_s0 + $0x198] sm:$0xff]  ;;  %v301_v7 = vpack.c.bf16 %v69_v0, %v61_v63 }
  0x14   :  { %2153 = vmatprep.subr.bf16.mxu0 %v2640_v20  ;;  %v71_v2 = vld [vmem:[%s3988_s0 + $0x150] sm:$0xff]  ;;  %v86_v4 = vld [vmem:[%s3988_s0 + $0x1c8] sm:$0xff]  ;;  %v88_v6 = vld [vmem:[%s3988_s0 + $0x1d8] sm:$0xff] }
  0x15   :  { %2264 = vmatpush3.bf16.msra.mxu1 %v2639_v19  ;;  %v303_v8 = vpack.c.bf16 %v71_v2, %v63_v1  ;;  %v310_v9 = vpack.c.bf16 %v86_v4, %v78_v3  ;;  %v312_v10 = vpack.c.bf16 %v88_v6, %v80_v5  ;;  %v77_v11 = vld [vmem:[%s3988_s0 + $0x180] sm:$0xff]  ;;  %v79_v13 = vld [vmem:[%s3988_s0 + $0x190] sm:$0xff]  ;;  %v94_v15 = vld [vmem:[%s3988_s0 + $0x208] sm:$0xff] }
  0x16   :  { %2265 = vmatprep.subr.bf16.mxu1 %v2642_v22  ;;  %v85_v12 = vld [vmem:[%s3988_s0 + $0x1c0] sm:$0xff]  ;;  %v87_v14 = vld [vmem:[%s3988_s0 + $0x1d0] sm:$0xff]  ;;  %v102_v16 = vld [vmem:[%s3988_s0 + $0x248] sm:$0xff] }
  0x17   :  { %2154 = vmatpush3.bf16.msra.mxu0 %v2641_v21  ;;  %v96_v17 = vld [vmem:[%s3988_s0 + $0x218] sm:$0xff]  ;;  %v2652_v19 = vld [vmem:[%s3989_s1 + $0x140] sm:$0xff]   ;;  %v309_v20 = vpack.c.bf16 %v85_v12, %v77_v11  ;;  %v311_v21 = vpack.c.bf16 %v87_v14, %v79_v13  ;;  %v318_v22 = vpack.c.bf16 %v102_v16, %v94_v15  ;;  %v118_v31 = vld [vmem:[%s3988_s0 + $0x2c8] sm:$0xff] }
  0x18   :  { %2155 = vmatprep.subr.bf16.mxu0 %v2644_v24  ;;  %v104_v18 = vld [vmem:[%s3988_s0 + $0x258] sm:$0xff]  ;;  %v2655_v33 = vld [vmem:[%s3989_s1 + $0x188] sm:$0xff]   ;;  %v2656_v36 = vld [vmem:[%s3989_s1 + $0x190] sm:$0xff]  }
  0x19   :  { %2266 = vmatpush3.bf16.msra.mxu1 %v2643_v23  ;;  %v2653_v23 = vld [vmem:[%s3989_s1 + $0x100] sm:$0xff]   ;;  %v320_v24 = vpack.c.bf16 %v104_v18, %v96_v17  ;;  %v112_v32 = vld [vmem:[%s3988_s0 + $0x298] sm:$0xff]  ;;  %v2658_v43 = vld [vmem:[%s3989_s1 + $0x108] sm:$0xff]  }
  0x1a   :  { %2267 = vmatprep.subr.bf16.mxu1 %v2646_v26  ;;  %v93_v26 = vld [vmem:[%s3988_s0 + $0x200] sm:$0xff]  ;;  %v119_v45 = vld [vmem:[%s3988_s0 + $0x2d0] sm:$0xff]  ;;  %v2659_v48 = vld [vmem:[%s3989_s1 + $0x198] sm:$0xff]  }
  0x1b   :  { %2156 = vmatpush3.bf16.msra.mxu0 %v2645_v25  ;;  %v2654_v25 = vld [vmem:[%s3989_s1 + $0x180] sm:$0xff]   ;;  %v134_v49 = vld [vmem:[%s3988_s0 + $0x348] sm:$0xff]  ;;  %v128_v50 = vld [vmem:[%s3988_s0 + $0x318] sm:$0xff] }
  0x1c   :  { %2157 = vmatprep.subr.bf16.mxu0 %v2648_v28  ;;  %v95_v28 = vld [vmem:[%s3988_s0 + $0x210] sm:$0xff]  ;;  %v109_v41 = vld [vmem:[%s3988_s0 + $0x280] sm:$0xff]  ;;  %v136_v51 = vld [vmem:[%s3988_s0 + $0x358] sm:$0xff] }
  0x1d   :  { %2268 = vmatpush3.bf16.msra.mxu1 %v2647_v27  ;;  %v101_v27 = vld [vmem:[%s3988_s0 + $0x240] sm:$0xff]  ;;  %v336_v56 = vpack.c.bf16 %v136_v51, %v128_v50  ;;  %v150_v63 = vld [vmem:[%s3988_s0 + $0x3c8] sm:$0xff]  ;;  %v2663_v0 = vld [vmem:[%s3989_s1 + $0x150] sm:$0xff]  }
  0x1e   :  { %2269 = vmatprep.subr.bf16.mxu1 %v2650_v30  ;;  %v110_v30 = vld [vmem:[%s3988_s0 + $0x288] sm:$0xff]  ;;  %v317_v35 = vpack.c.bf16 %v101_v27, %v93_v26  ;;  %v117_v42 = vld [vmem:[%s3988_s0 + $0x2c0] sm:$0xff]  ;;  %v2664_v1 = vld [vmem:[%s3989_s1 + $0x110] sm:$0xff]  }
  0x1f   :  { %2158 = vmatpush3.bf16.msra.mxu0 %v2649_v29  ;;  %v103_v29 = vld [vmem:[%s3988_s0 + $0x250] sm:$0xff]  ;;  %v326_v38 = vpack.c.bf16 %v118_v31, %v110_v30  ;;  %v2660_v53 = vld [vmem:[%s3989_s1 + $0x1a0] sm:$0xff]   ;;  %v144_v2 = vld [vmem:[%s3988_s0 + $0x398] sm:$0xff] }
  0x20   :  { %2367 = vmatprep.subr.bf16.mxu0 %v2652_v19  ;;  %v319_v37 = vpack.c.bf16 %v103_v29, %v95_v28  ;;  %v125_v57 = vld [vmem:[%s3988_s0 + $0x300] sm:$0xff]  ;;  %v152_v3 = vld [vmem:[%s3988_s0 + $0x3d8] sm:$0xff]  ;;  %v2662_v5 = vld [vmem:[%s3989_s1 + $0x1b0] sm:$0xff]  }
  0x21   :  { %2270 = vmatpush3.bf16.msra.mxu1 %v2651_v34  ;;  %v120_v34 = vld [vmem:[%s3988_s0 + $0x2d8] sm:$0xff]  ;;  %v133_v58 = vld [vmem:[%s3988_s0 + $0x340] sm:$0xff]  ;;  %v143_v11 = vld [vmem:[%s3988_s0 + $0x390] sm:$0xff] }
  0x22   :  { %1456 = vmatprep.subr.bf16.mxu1 %v2723_v46  ;;  %1006 = vmatmul.mubr.bf16.vlgmr.msra.gmra.mrb[0].mxu0 %v285_v39  ;;  %v2657_v39 = vld [vmem:[%s3989_s1 + $0x148] sm:$0xff]   ;;  %v328_v40 = vpack.c.bf16 %v120_v34, %v112_v32  ;;  %v333_v4 = vpack.c.bf16 %v133_v58, %v125_v57  ;;  %v151_v12 = vld [vmem:[%s3988_s0 + $0x3d0] sm:$0xff]  ;;  %v2665_v14 = vld [vmem:[%s3989_s1 + $0x1b8] sm:$0xff]  }
  0x23   :  { %1013 = vmatprep.mubr.bf16.mxu0 %v294_v47  ;;  %2368 = vmatpush3.bf16.msra.mxu0 %v2653_v23  ;;  %v126_v47 = vld [vmem:[%s3988_s0 + $0x308] sm:$0xff]  ;;  %v2668_v16 = vld [vmem:[%s3989_s1 + $0x158] sm:$0xff]   ;;  %v165_v26 = vld [vmem:[%s3988_s0 + $0x440] sm:$0xff] }
  0x24   :  { %1167 = vmatmul.mubr.bf16.vlgmr.msra.gmra.mrb[0].mxu1 %v287_v44  ;;  %2369 = vmatprep.subr.bf16.mxu0 %v2657_v39  ;;  %v111_v44 = vld [vmem:[%s3988_s0 + $0x290] sm:$0xff]  ;;  %v334_v55 = vpack.c.bf16 %v134_v49, %v126_v47  ;;  %v158_v13 = vld [vmem:[%s3988_s0 + $0x408] sm:$0xff]  ;;  %v160_v17 = vld [vmem:[%s3988_s0 + $0x418] sm:$0xff] }
  0x25   :  { %1174 = vmatprep.mubr.bf16.mxu1 %v296_v52  ;;  %1457 = vmatpush1.bf16.msra.mxu1 %v2654_v25  ;;  %v325_v52 = vpack.c.bf16 %v117_v42, %v109_v41  ;;  %v327_v54 = vpack.c.bf16 %v119_v45, %v111_v44  ;;  %v166_v15 = vld [vmem:[%s3988_s0 + $0x448] sm:$0xff]  ;;  %v168_v18 = vld [vmem:[%s3988_s0 + $0x458] sm:$0xff]  ;;  %v157_v25 = vld [vmem:[%s3988_s0 + $0x400] sm:$0xff] }
  0x26   :  { %1458 = vmatprep.subr.bf16.mxu1 %v2723_v46  ;;  %v2669_v19 = vld [vmem:[%s3989_s1 + $0x118] sm:$0xff]   ;;  %v350_v23 = vpack.c.bf16 %v166_v15, %v158_v13  ;;  %v2671_v27 = vld [vmem:[%s3989_s1 + $0x160] sm:$0xff]   ;;  %v159_v28 = vld [vmem:[%s3988_s0 + $0x410] sm:$0xff] }
  0x27   :  { %2370 = vmatpush3.bf16.msra.mxu0 %v2658_v43  ;;  %v167_v29 = vld [vmem:[%s3988_s0 + $0x450] sm:$0xff]  ;;  %v174_v30 = vld [vmem:[%s3988_s0 + $0x488] sm:$0xff]  ;;  %v176_v34 = vld [vmem:[%s3988_s0 + $0x498] sm:$0xff] }
  0x28   :  { %2371 = vmatprep.subr.bf16.mxu0 %v2663_v0  ;;  %v182_v31 = vld [vmem:[%s3988_s0 + $0x4c8] sm:$0xff]  ;;  %v351_v39 = vpack.c.bf16 %v167_v29, %v159_v28  ;;  %v173_v42 = vld [vmem:[%s3988_s0 + $0x480] sm:$0xff]  ;;  %v2673_v44 = vld [vmem:[%s3989_s1 + $0x1d8] sm:$0xff]  }
  0x29   :  { %1459 = vmatpush1.bf16.msra.mxu1 %v2655_v33  ;;  %v2667_v32 = vld [vmem:[%s3989_s1 + $0x1c8] sm:$0xff]   ;;  %v2672_v33 = vld [vmem:[%s3989_s1 + $0x120] sm:$0xff]   ;;  %v175_v47 = vld [vmem:[%s3988_s0 + $0x490] sm:$0xff] }
  0x2a   :  { %1014 = vmatmul.mubr.bf16.gmra.mrb[4].mxu0 %v293_v59  ;;  %1460 = vmatprep.subr.bf16.mxu1 %v2723_v46  ;;  %v127_v59 = vld [vmem:[%s3988_s0 + $0x310] sm:$0xff]  ;;  %v181_v43 = vld [vmem:[%s3988_s0 + $0x4c0] sm:$0xff]  ;;  %v2675_v45 = vld [vmem:[%s3989_s1 + $0x128] sm:$0xff]  }
  0x2b   :  { %1021 = vmatprep.mubr.bf16.mxu0 %v302_v61  ;;  %v2661_v61 = vld [vmem:[%s3989_s1 + $0x1a8] sm:$0xff]   ;;  %2372 = vmatpush3.bf16.msra.mxu0 %v2664_v1  ;;  %v2677_v50 = vld [vmem:[%s3989_s1 + $0x170] sm:$0xff]   ;;  %v197_v0 = vld [vmem:[%s3988_s0 + $0x540] sm:$0xff] }
  0x2c   :  { %1175 = vmatmul.mubr.bf16.gmra.mrb[4].mxu1 %v295_v60  ;;  %v135_v60 = vld [vmem:[%s3988_s0 + $0x350] sm:$0xff]  ;;  %2373 = vmatprep.subr.bf16.mxu0 %v2668_v16  ;;  %v190_v49 = vld [vmem:[%s3988_s0 + $0x508] sm:$0xff]  ;;  %v205_v13 = vld [vmem:[%s3988_s0 + $0x580] sm:$0xff] }
  0x2d   :  { %1182 = vmatprep.mubr.bf16.mxu1 %v304_v62  ;;  %1461 = vmatpush1.bf16.msra.mxu1 %v2656_v36  ;;  %v142_v62 = vld [vmem:[%s3988_s0 + $0x388] sm:$0xff]  ;;  %v335_v6 = vpack.c.bf16 %v135_v60, %v127_v59  ;;  %v184_v36 = vld [vmem:[%s3988_s0 + $0x4d8] sm:$0xff]  ;;  %v191_v1 = vld [vmem:[%s3988_s0 + $0x510] sm:$0xff] }
  0x2e   :  { %1462 = vmatprep.subr.bf16.mxu1 %v2723_v46  ;;  %v360_v41 = vpack.c.bf16 %v184_v36, %v176_v34  ;;  %v198_v51 = vld [vmem:[%s3988_s0 + $0x548] sm:$0xff]  ;;  %v2680_v60 = vld [vmem:[%s3989_s1 + $0x178] sm:$0xff]   ;;  %v207_v15 = vld [vmem:[%s3988_s0 + $0x590] sm:$0xff] }
  0x2f   :  { %2374 = vmatpush3.bf16.msra.mxu0 %v2669_v19  ;;  %v366_v58 = vpack.c.bf16 %v198_v51, %v190_v49  ;;  %v222_v16 = vld [vmem:[%s3988_s0 + $0x608] sm:$0xff]  ;;  %v232_v19 = vld [vmem:[%s3988_s0 + $0x658] sm:$0xff]  ;;  %v237_v36 = vld [vmem:[%s3988_s0 + $0x680] sm:$0xff] }
  0x30   :  { %2375 = vmatprep.subr.bf16.mxu0 %v2671_v27  ;;  %v231_v27 = vld [vmem:[%s3988_s0 + $0x650] sm:$0xff]  ;;  %v238_v28 = vld [vmem:[%s3988_s0 + $0x688] sm:$0xff]  ;;  %v253_v49 = vld [vmem:[%s3988_s0 + $0x700] sm:$0xff] }
  0x31   :  { %1463 = vmatpush1.bf16.msra.mxu1 %v2659_v48  ;;  %v183_v48 = vld [vmem:[%s3988_s0 + $0x4d0] sm:$0xff]  ;;  %v246_v29 = vld [vmem:[%s3988_s0 + $0x6c8] sm:$0xff] }
  0x32   :  { %1022 = vmatmul.mubr.bf16.gmra.mrb[8].mxu0 %v301_v7  ;;  %1464 = vmatprep.subr.bf16.mxu1 %v2723_v46  ;;  %v342_v7 = vpack.c.bf16 %v150_v63, %v142_v62  ;;  %v359_v57 = vpack.c.bf16 %v183_v48, %v175_v47  ;;  %v2679_v62 = vld [vmem:[%s3989_s1 + $0x1e8] sm:$0xff]   ;;  %v2681_v63 = vld [vmem:[%s3989_s1 + $0x138] sm:$0xff]   ;;  %v390_v34 = vpack.c.bf16 %v246_v29, %v238_v28  ;;  %v255_v51 = vld [vmem:[%s3988_s0 + $0x710] sm:$0xff] }
  0x33   :  { %1029 = vmatprep.mubr.bf16.mxu0 %v310_v9  ;;  %v141_v9 = vld [vmem:[%s3988_s0 + $0x380] sm:$0xff]  ;;  %2376 = vmatpush3.bf16.msra.mxu0 %v2672_v33 }
  0x34   :  { %1183 = vmatmul.mubr.bf16.gmra.mrb[8].mxu1 %v303_v8  ;;  %v344_v8 = vpack.c.bf16 %v152_v3, %v144_v2  ;;  %v2682_v2 = vld [vmem:[%s3989_s1 + $0x1f0] ss:$0 sps:$4 sm:$0xff]  }
  0x35   :  { %1190 = vmatprep.mubr.bf16.mxu1 %v312_v10  ;;  %1465 = vmatpush1.bf16.msra.mxu1 %v2660_v53  ;;  %v149_v10 = vld [vmem:[%s3988_s0 + $0x3c0] sm:$0xff]  ;;  %v200_v53 = vld [vmem:[%s3988_s0 + $0x558] sm:$0xff]  ;;  %v199_v3 = vld [vmem:[%s3988_s0 + $0x550] sm:$0xff] }
  0x36   :  { %1466 = vmatprep.subr.bf16.mxu1 %v2723_v46 }
  0x39   :  { %1467 = vmatpush1.bf16.msra.mxu1 %v2661_v61  ;;  %v189_v61 = vld [vmem:[%s3988_s0 + $0x500] sm:$0xff] }
  0x3a   :  { %1030 = vmatmul.mubr.bf16.gmra.mrb[12].mxu0 %v309_v20  ;;  %1468 = vmatprep.subr.bf16.mxu1 %v2723_v46  ;;  %v341_v20 = vpack.c.bf16 %v149_v10, %v141_v9  ;;  %v367_v9 = vpack.c.bf16 %v199_v3, %v191_v1  ;;  %v34_v1 = vld [vmem:[%s3988_s0 + $0x28] sm:$0xff]  ;;  %v36_v3 = vld [vmem:[%s3988_s0 + $0x38] sm:$0xff] }
  0x3b   :  { %1037 = vmatprep.mubr.bf16.mxu0 %v318_v22  ;;  %v343_v22 = vpack.c.bf16 %v151_v12, %v143_v11  ;;  %v971_v11 = vsel %vm969_vm0, %v2682_v2, 0  ;;  %v42_v2 = vld [vmem:[%s3988_s0 + $0x68] sm:$0xff] }
  0x3c   :  { %1191 = vmatmul.mubr.bf16.gmra.mrb[12].mxu1 %v311_v21  ;;  %v2666_v21 = vld [vmem:[%s3989_s1 + $0x1c0] sm:$0xff]  }
  0x3d   :  { %1198 = vmatprep.mubr.bf16.mxu1 %v320_v24  ;;  %1469 = vmatpush1.bf16.msra.mxu1 %v2662_v5  ;;  %v352_v24 = vpack.c.bf16 %v168_v18, %v160_v17  ;;  %v214_v5 = vld [vmem:[%s3988_s0 + $0x5c8] sm:$0xff]  ;;  %v224_v18 = vld [vmem:[%s3988_s0 + $0x618] sm:$0xff] }
  0x3e   :  { %1470 = vmatprep.subr.bf16.mxu1 %v2723_v46  ;;  %v230_v17 = vld [vmem:[%s3988_s0 + $0x648] sm:$0xff] }
  0x41   :  { %1471 = vmatpush1.bf16.msra.mxu1 %v2665_v14  ;;  %v213_v14 = vld [vmem:[%s3988_s0 + $0x5c0] sm:$0xff] }
  0x42   :  { %1038 = vmatmul.mubr.bf16.gmra.mrb[16].mxu0 %v317_v35  ;;  %1472 = vmatprep.subr.bf16.mxu1 %v2723_v46  ;;  %v2674_v35 = vld [vmem:[%s3989_s1 + $0x168] sm:$0xff]  }
  0x43   :  { %1045 = vmatprep.mubr.bf16.mxu0 %v326_v38  ;;  %v2670_v38 = vld [vmem:[%s3989_s1 + $0x1d0] sm:$0xff]   ;;  %2377 = vmatprep.subr.bf16.mxu0 %v2674_v35 }
  0x44   :  { %1199 = vmatmul.mubr.bf16.gmra.mrb[16].mxu1 %v319_v37  ;;  %v349_v37 = vpack.c.bf16 %v165_v26, %v157_v25  ;;  %2378 = vmatpush3.bf16.msra.mxu0 %v2675_v45  ;;  %v229_v25 = vld [vmem:[%s3988_s0 + $0x640] sm:$0xff]  ;;  %v223_v26 = vld [vmem:[%s3988_s0 + $0x610] sm:$0xff] }
  0x45   :  { %1206 = vmatprep.mubr.bf16.mxu1 %v328_v40  ;;  %1473 = vmatpush1.bf16.msra.mxu1 %v2666_v21  ;;  %v358_v40 = vpack.c.bf16 %v182_v31, %v174_v30  ;;  %v240_v30 = vld [vmem:[%s3988_s0 + $0x698] sm:$0xff]  ;;  %v383_v33 = vpack.c.bf16 %v231_v27, %v223_v26 }
  0x46   :  { %1474 = vmatprep.subr.bf16.mxu1 %v2723_v46  ;;  %2379 = vmatprep.subr.bf16.mxu0 %v2677_v50  ;;  %v248_v31 = vld [vmem:[%s3988_s0 + $0x6d8] sm:$0xff]  ;;  %v261_v50 = vld [vmem:[%s3988_s0 + $0x740] sm:$0xff] }
  0x47   :  { %v392_v35 = vpack.c.bf16 %v248_v31, %v240_v30 }
  0x49   :  { %1475 = vmatpush1.bf16.msra.mxu1 %v2667_v32 }
  0x4a   :  { %1046 = vmatmul.mubr.bf16.gmra.mrb[20].mxu0 %v325_v52  ;;  %1476 = vmatprep.subr.bf16.mxu1 %v2723_v46  ;;  %v192_v52 = vld [vmem:[%s3988_s0 + $0x518] sm:$0xff] }
  0x4b   :  { %1053 = vmatprep.mubr.bf16.mxu0 %v334_v55  ;;  %v357_v55 = vpack.c.bf16 %v181_v43, %v173_v42  ;;  %v368_v59 = vpack.c.bf16 %v200_v53, %v192_v52  ;;  %v256_v42 = vld [vmem:[%s3988_s0 + $0x718] sm:$0xff]  ;;  %v263_v52 = vld [vmem:[%s3988_s0 + $0x750] sm:$0xff]  ;;  %v270_v53 = vld [vmem:[%s3988_s0 + $0x788] sm:$0xff] }
  0x4c   :  { %1207 = vmatmul.mubr.bf16.gmra.mrb[20].mxu1 %v327_v54  ;;  %v2678_v54 = vld [vmem:[%s3989_s1 + $0x130] sm:$0xff]   ;;  %v264_v43 = vld [vmem:[%s3988_s0 + $0x758] sm:$0xff] }
  0x4d   :  { %1214 = vmatprep.mubr.bf16.mxu1 %v336_v56  ;;  %1477 = vmatpush1.bf16.msra.mxu1 %v2670_v38  ;;  %v2676_v56 = vld [vmem:[%s3989_s1 + $0x1e0] sm:$0xff]   ;;  %v239_v38 = vld [vmem:[%s3988_s0 + $0x690] sm:$0xff]  ;;  %v400_v48 = vpack.c.bf16 %v264_v43, %v256_v42 }
  0x4e   :  { %1478 = vmatprep.subr.bf16.mxu1 %v2723_v46  ;;  %2380 = vmatpush3.bf16.msra.mxu0 %v2678_v54  ;;  %v278_v54 = vld [vmem:[%s3988_s0 + $0x7c8] sm:$0xff] }
  0x4f   :  { %2381 = vmatprep.subr.bf16.mxu0 %v2680_v60 }
  0x51   :  { %1479 = vmatpush1.bf16.msra.mxu1 %v2673_v44 }
  0x52   :  { %1054 = vmatmul.mubr.bf16.gmra.mrb[24].mxu0 %v333_v4  ;;  %1480 = vmatprep.subr.bf16.mxu1 %v2723_v46  ;;  %v206_v4 = vld [vmem:[%s3988_s0 + $0x588] sm:$0xff] }
  0x53   :  { %1061 = vmatprep.mubr.bf16.mxu0 %v342_v7  ;;  %v216_v7 = vld [vmem:[%s3988_s0 + $0x5d8] sm:$0xff]  ;;  %2382 = vmatpush3.bf16.msra.mxu0 %v2681_v63  ;;  %v374_v10 = vpack.c.bf16 %v214_v5, %v206_v4  ;;  %v271_v63 = vld [vmem:[%s3988_s0 + $0x790] sm:$0xff] }
  0x54   :  { %1215 = vmatmul.mubr.bf16.gmra.mrb[24].mxu1 %v335_v6  ;;  %v208_v6 = vld [vmem:[%s3988_s0 + $0x598] sm:$0xff] }
  0x55   :  { %1222 = vmatprep.mubr.bf16.mxu1 %v344_v8  ;;  %1481 = vmatpush1.bf16.msra.mxu1 %v2676_v56  ;;  %v365_v8 = vpack.c.bf16 %v197_v0, %v189_v61  ;;  %v376_v12 = vpack.c.bf16 %v216_v7, %v208_v6  ;;  %v280_v56 = vld [vmem:[%s3988_s0 + $0x7d8] sm:$0xff]  ;;  %v269_v61 = vld [vmem:[%s3988_s0 + $0x780] sm:$0xff]  ;;  %v279_v0 = vld [vmem:[%s3988_s0 + $0x7d0] sm:$0xff] }
  0x56   :  { %1482 = vmatprep.subr.bf16.mxu1 %v2723_v46  ;;  %v44_v4 = vld [vmem:[%s3988_s0 + $0x78] sm:$0xff] }
  0x59   :  { %1483 = vmatpush1.bf16.msra.mxu1 %v2679_v62  ;;  %v277_v62 = vld [vmem:[%s3988_s0 + $0x7c0] sm:$0xff] }
  0x5a   :  { %1062 = vmatmul.mubr.bf16.gmra.mrb[28].mxu0 %v341_v20  ;;  %1484 = vmatprep.subr.bf16.mxu1 %v2723_v46  ;;  %v215_v46 = vld [vmem:[%s3988_s0 + $0x5d0] sm:$0xff]  ;;  %v373_v20 = vpack.c.bf16 %v213_v14, %v205_v13 }
  0x5b   :  { %1069 = vmatprep.mubr.bf16.mxu0 %v350_v23  ;;  %v375_v21 = vpack.c.bf16 %v215_v46, %v207_v15  ;;  %v384_v23 = vpack.c.bf16 %v232_v19, %v224_v18 }
  0x5c   :  { %1223 = vmatmul.mubr.bf16.gmra.mrb[28].mxu1 %v343_v22  ;;  %v382_v22 = vpack.c.bf16 %v230_v17, %v222_v16 }
  0x5d   :  { %1230 = vmatprep.mubr.bf16.mxu1 %v352_v24  ;;  %1485 = vmatpush1.bf16.msra.mxu1 %v971_v11  ;;  %v221_v24 = vld [vmem:[%s3988_s0 + $0x600] sm:$0xff] }
  0x5e   :  { %v381_v32 = vpack.c.bf16 %v229_v25, %v221_v24 }
  0x62   :  { %1070 = vmatmul.mubr.bf16.gmra.mrb[32].mxu0 %v349_v37  ;;  %v245_v37 = vld [vmem:[%s3988_s0 + $0x6c0] sm:$0xff] }
  0x63   :  { %1077 = vmatprep.mubr.bf16.mxu0 %v358_v40  ;;  %v254_v40 = vld [vmem:[%s3988_s0 + $0x708] sm:$0xff]  ;;  %v389_v44 = vpack.c.bf16 %v245_v37, %v237_v36 }
  0x64   :  { %1231 = vmatmul.mubr.bf16.gmra.mrb[32].mxu1 %v351_v39  ;;  %v247_v39 = vld [vmem:[%s3988_s0 + $0x6d0] sm:$0xff] }
  0x65   :  { %1238 = vmatprep.mubr.bf16.mxu1 %v360_v41  ;;  %v262_v41 = vld [vmem:[%s3988_s0 + $0x748] sm:$0xff]  ;;  %v391_v45 = vpack.c.bf16 %v247_v39, %v239_v38 }
  0x66   :  { %v398_v47 = vpack.c.bf16 %v262_v41, %v254_v40 }
  0x6a   :  { %1078 = vmatmul.mubr.bf16.gmra.mrb[36].mxu0 %v357_v55  ;;  %v272_v55 = vld [vmem:[%s3988_s0 + $0x798] sm:$0xff] }
  0x6b   :  { %1085 = vmatprep.mubr.bf16.mxu0 %v366_v58  ;;  %v399_v58 = vpack.c.bf16 %v263_v52, %v255_v51  ;;  %v408_v60 = vpack.c.bf16 %v280_v56, %v272_v55 }
  0x6c   :  { %1239 = vmatmul.mubr.bf16.gmra.mrb[36].mxu1 %v359_v57  ;;  %v397_v57 = vpack.c.bf16 %v261_v50, %v253_v49 }
  0x6d   :  { %1246 = vmatprep.mubr.bf16.mxu1 %v368_v59  ;;  %v406_v59 = vpack.c.bf16 %v278_v54, %v270_v53 }
  0x72   :  { %1086 = vmatmul.mubr.bf16.gmra.mrb[40].mxu0 %v365_v8 }
  0x73   :  { %1093 = vmatprep.mubr.bf16.mxu0 %v374_v10 }
  0x74   :  { %1247 = vmatmul.mubr.bf16.gmra.mrb[40].mxu1 %v367_v9 }
  0x75   :  { %1254 = vmatprep.mubr.bf16.mxu1 %v376_v12 }
  0x7a   :  { %1094 = vmatmul.mubr.bf16.gmra.mrb[44].mxu0 %v373_v20 }
  0x7b   :  { %1101 = vmatprep.mubr.bf16.mxu0 %v382_v22 }
  0x7c   :  { %1255 = vmatmul.mubr.bf16.gmra.mrb[44].mxu1 %v375_v21 }
  0x7d   :  { %1262 = vmatprep.mubr.bf16.mxu1 %v384_v23 }
  0x82   :  { %1102 = vmatmul.mubr.bf16.gmra.mrb[48].mxu0 %v381_v32 }
  0x83   :  { %1109 = vmatprep.mubr.bf16.mxu0 %v390_v34 }
  0x84   :  { %1263 = vmatmul.mubr.bf16.gmra.mrb[48].mxu1 %v383_v33 }
  0x85   :  { %1270 = vmatprep.mubr.bf16.mxu1 %v392_v35 }
  0x8a   :  { %1110 = vmatmul.mubr.bf16.gmra.mrb[52].mxu0 %v389_v44 }
  0x8b   :  { %1117 = vmatprep.mubr.bf16.mxu0 %v398_v47 }
  0x8c   :  { %1271 = vmatmul.mubr.bf16.gmra.mrb[52].mxu1 %v391_v45 }
  0x8d   :  { %1278 = vmatprep.mubr.bf16.mxu1 %v400_v48 }
  0x92   :  { %1118 = vmatmul.mubr.bf16.gmra.mrb[56].mxu0 %v397_v57 }
  0x93   :  { %1125 = vmatprep.mubr.bf16.mxu0 %v406_v59 }
  0x94   :  { %1279 = vmatmul.mubr.bf16.gmra.mrb[56].mxu1 %v399_v58 }
  0x95   :  { %1286 = vmatprep.mubr.bf16.mxu1 %v408_v60 }
  0x96   :  { %13 = vsyncpa [#allocation4], 0  ;;  %v405_v5 = vpack.c.bf16 %v277_v62, %v269_v61  ;;  %v407_v6 = vpack.c.bf16 %v279_v0, %v271_v63  ;;  %v290_v7 = vpack.c.bf16 %v42_v2, %v34_v1  ;;  %v292_v8 = vpack.c.bf16 %v44_v4, %v36_v3  ;;  %v33_v9 = vld [vmem:[%s3988_s0 + $0x20] sm:$0xff]  ;;  %v35_v11 = vld [vmem:[%s3988_s0 + $0x30] sm:$0xff] }
  0x97   :  { %vm920_vm1 = vcmask 850944   ;;  %v41_v10 = vld [vmem:[%s3988_s0 + $0x60] sm:$0xff]  ;;  %v43_v12 = vld [vmem:[%s3988_s0 + $0x70] sm:$0xff]  ;;  %v50_v13 = vld [vmem:[%s3988_s0 + $0xa8] sm:$0xff] }
  0x98   :  { %v58_v14 = vld [vmem:[%s3988_s0 + $0xe8] sm:$0xff]  ;;  %v52_v15 = vld [vmem:[%s3988_s0 + $0xb8] sm:$0xff]  ;;  %v289_v16 = vpack.c.bf16 %v41_v10, %v33_v9  ;;  %v291_v17 = vpack.c.bf16 %v43_v12, %v35_v11  ;;  %v49_v20 = vld [vmem:[%s3988_s0 + $0xa0] sm:$0xff] }
  0x99   :  { %v60_v46 = vld [vmem:[%s3988_s0 + $0xf8] sm:$0xff]  ;;  %v298_v18 = vpack.c.bf16 %v58_v14, %v50_v13  ;;  %v57_v21 = vld [vmem:[%s3988_s0 + $0xe0] sm:$0xff]  ;;  %v51_v22 = vld [vmem:[%s3988_s0 + $0xb0] sm:$0xff] }
  0x9a   :  { %1126 = vmatmul.mubr.bf16.gmra.mrb[60].mxu0 %v405_v5  ;;  %v300_v19 = vpack.c.bf16 %v60_v46, %v52_v15  ;;  %v59_v23 = vld [vmem:[%s3988_s0 + $0xf0] sm:$0xff]  ;;  %v66_v24 = vld [vmem:[%s3988_s0 + $0x128] sm:$0xff]  ;;  %v68_v26 = vld [vmem:[%s3988_s0 + $0x138] sm:$0xff]  ;;  %v297_v28 = vpack.c.bf16 %v57_v21, %v49_v20 }
  0x9b   :  { %1327 = vmatprep.mubr.bf16.mxu0 %v290_v7  ;;  %v74_v25 = vld [vmem:[%s3988_s0 + $0x168] sm:$0xff]  ;;  %v76_v27 = vld [vmem:[%s3988_s0 + $0x178] sm:$0xff]  ;;  %v299_v29 = vpack.c.bf16 %v59_v23, %v51_v22  ;;  %v65_v32 = vld [vmem:[%s3988_s0 + $0x120] sm:$0xff] }
  0x9c   :  { %1287 = vmatmul.mubr.bf16.gmra.mrb[60].mxu1 %v407_v6  ;;  %v306_v30 = vpack.c.bf16 %v74_v25, %v66_v24  ;;  %v308_v31 = vpack.c.bf16 %v76_v27, %v68_v26  ;;  %v73_v33 = vld [vmem:[%s3988_s0 + $0x160] sm:$0xff]  ;;  %v67_v34 = vld [vmem:[%s3988_s0 + $0x130] sm:$0xff]  ;;  %v82_v36 = vld [vmem:[%s3988_s0 + $0x1a8] sm:$0xff] }
  0x9d   :  { %2116 = vmatprep.mubr.msk.bf16.mxu1 %vm920_vm1, %v292_v8  ;;  %v75_v35 = vld [vmem:[%s3988_s0 + $0x170] sm:$0xff]  ;;  %v90_v37 = vld [vmem:[%s3988_s0 + $0x1e8] sm:$0xff]  ;;  %v84_v38 = vld [vmem:[%s3988_s0 + $0x1b8] sm:$0xff]  ;;  %v305_v40 = vpack.c.bf16 %v73_v33, %v65_v32 }
  0x9e   :  { %v92_v39 = vld [vmem:[%s3988_s0 + $0x1f8] sm:$0xff]  ;;  %v307_v41 = vpack.c.bf16 %v75_v35, %v67_v34  ;;  %v314_v42 = vpack.c.bf16 %v90_v37, %v82_v36  ;;  %v81_v44 = vld [vmem:[%s3988_s0 + $0x1a0] sm:$0xff]  ;;  %v83_v47 = vld [vmem:[%s3988_s0 + $0x1b0] sm:$0xff] }
  0x9f   :  { %v316_v43 = vpack.c.bf16 %v92_v39, %v84_v38  ;;  %v89_v45 = vld [vmem:[%s3988_s0 + $0x1e0] sm:$0xff]  ;;  %v91_v48 = vld [vmem:[%s3988_s0 + $0x1f0] sm:$0xff]  ;;  %v98_v49 = vld [vmem:[%s3988_s0 + $0x228] sm:$0xff] }
  0xa0   :  { %v106_v50 = vld [vmem:[%s3988_s0 + $0x268] sm:$0xff]  ;;  %v100_v51 = vld [vmem:[%s3988_s0 + $0x238] sm:$0xff]  ;;  %v313_v53 = vpack.c.bf16 %v89_v45, %v81_v44  ;;  %v315_v54 = vpack.c.bf16 %v91_v48, %v83_v47  ;;  %v97_v57 = vld [vmem:[%s3988_s0 + $0x220] sm:$0xff] }
  0xa1   :  { %v108_v52 = vld [vmem:[%s3988_s0 + $0x278] sm:$0xff]  ;;  %v322_v55 = vpack.c.bf16 %v106_v50, %v98_v49  ;;  %v105_v58 = vld [vmem:[%s3988_s0 + $0x260] sm:$0xff]  ;;  %v99_v59 = vld [vmem:[%s3988_s0 + $0x230] sm:$0xff] }
  0xa2   :  { %1328 = vmatmul.mubr.bf16.vlgmr.msra.gmra.mrb[64].mxu0 %v289_v16  ;;  %v324_v56 = vpack.c.bf16 %v108_v52, %v100_v51  ;;  %v107_v60 = vld [vmem:[%s3988_s0 + $0x270] sm:$0xff]  ;;  %v114_v61 = vld [vmem:[%s3988_s0 + $0x2a8] sm:$0xff]  ;;  %v116_v63 = vld [vmem:[%s3988_s0 + $0x2b8] sm:$0xff]  ;;  %v321_v1 = vpack.c.bf16 %v105_v58, %v97_v57 }
  0xa3   :  { %1335 = vmatprep.mubr.bf16.mxu0 %v298_v18  ;;  %v122_v62 = vld [vmem:[%s3988_s0 + $0x2e8] sm:$0xff]  ;;  %v124_v0 = vld [vmem:[%s3988_s0 + $0x2f8] sm:$0xff]  ;;  %v323_v2 = vpack.c.bf16 %v107_v60, %v99_v59  ;;  %v113_v5 = vld [vmem:[%s3988_s0 + $0x2a0] sm:$0xff] }
  0xa4   :  { %1489 = vmatmul.mubr.bf16.vlgmr.msra.gmra.mrb[64].mxu1 %v291_v17  ;;  %v330_v3 = vpack.c.bf16 %v122_v62, %v114_v61  ;;  %v332_v4 = vpack.c.bf16 %v124_v0, %v116_v63  ;;  %v121_v6 = vld [vmem:[%s3988_s0 + $0x2e0] sm:$0xff]  ;;  %v115_v7 = vld [vmem:[%s3988_s0 + $0x2b0] sm:$0xff]  ;;  %v130_v9 = vld [vmem:[%s3988_s0 + $0x328] sm:$0xff] }
  0xa5   :  { %2117 = vmatprep.mubr.msk.bf16.mxu1 %vm920_vm1, %v300_v19  ;;  %v123_v8 = vld [vmem:[%s3988_s0 + $0x2f0] sm:$0xff]  ;;  %v138_v10 = vld [vmem:[%s3988_s0 + $0x368] sm:$0xff]  ;;  %v132_v11 = vld [vmem:[%s3988_s0 + $0x338] sm:$0xff]  ;;  %v329_v13 = vpack.c.bf16 %v121_v6, %v113_v5 }
  0xa6   :  { %v140_v12 = vld [vmem:[%s3988_s0 + $0x378] sm:$0xff]  ;;  %v331_v14 = vpack.c.bf16 %v123_v8, %v115_v7  ;;  %v338_v15 = vpack.c.bf16 %v138_v10, %v130_v9  ;;  %v129_v16 = vld [vmem:[%s3988_s0 + $0x320] sm:$0xff]  ;;  %v131_v18 = vld [vmem:[%s3988_s0 + $0x330] sm:$0xff] }
  0xa7   :  { %v340_v46 = vpack.c.bf16 %v140_v12, %v132_v11  ;;  %v137_v17 = vld [vmem:[%s3988_s0 + $0x360] sm:$0xff]  ;;  %v139_v19 = vld [vmem:[%s3988_s0 + $0x370] sm:$0xff]  ;;  %v146_v20 = vld [vmem:[%s3988_s0 + $0x3a8] sm:$0xff] }
  0xa8   :  { %v154_v21 = vld [vmem:[%s3988_s0 + $0x3e8] sm:$0xff]  ;;  %v148_v22 = vld [vmem:[%s3988_s0 + $0x3b8] sm:$0xff]  ;;  %v337_v24 = vpack.c.bf16 %v137_v17, %v129_v16  ;;  %v339_v25 = vpack.c.bf16 %v139_v19, %v131_v18  ;;  %v203_v5 = vld [vmem:[%s3988_s0 + $0x570] sm:$0xff] }
  0xa9   :  { %v156_v23 = vld [vmem:[%s3988_s0 + $0x3f8] sm:$0xff]  ;;  %v346_v26 = vpack.c.bf16 %v154_v21, %v146_v20  ;;  %v162_v32 = vld [vmem:[%s3988_s0 + $0x428] sm:$0xff]  ;;  %v217_v16 = vld [vmem:[%s3988_s0 + $0x5e0] sm:$0xff] }
  0xaa   :  { %1336 = vmatmul.mubr.bf16.gmra.mrb[68].mxu0 %v297_v28  ;;  %v348_v27 = vpack.c.bf16 %v156_v23, %v148_v22  ;;  %v145_v28 = vld [vmem:[%s3988_s0 + $0x3a0] sm:$0xff]  ;;  %v170_v33 = vld [vmem:[%s3988_s0 + $0x468] sm:$0xff]  ;;  %v164_v34 = vld [vmem:[%s3988_s0 + $0x438] sm:$0xff] }
  0xab   :  { %1343 = vmatprep.mubr.bf16.mxu0 %v306_v30  ;;  %v147_v30 = vld [vmem:[%s3988_s0 + $0x3b0] sm:$0xff]  ;;  %v172_v35 = vld [vmem:[%s3988_s0 + $0x478] sm:$0xff]  ;;  %v354_v38 = vpack.c.bf16 %v170_v33, %v162_v32  ;;  %v178_v44 = vld [vmem:[%s3988_s0 + $0x4a8] sm:$0xff] }
  0xac   :  { %1497 = vmatmul.mubr.bf16.gmra.mrb[68].mxu1 %v299_v29  ;;  %v153_v29 = vld [vmem:[%s3988_s0 + $0x3e0] sm:$0xff]  ;;  %v356_v39 = vpack.c.bf16 %v172_v35, %v164_v34  ;;  %v186_v45 = vld [vmem:[%s3988_s0 + $0x4e8] sm:$0xff]  ;;  %v180_v47 = vld [vmem:[%s3988_s0 + $0x4b8] sm:$0xff] }
  0xad   :  { %2118 = vmatprep.mubr.msk.bf16.mxu1 %vm920_vm1, %v308_v31  ;;  %v155_v31 = vld [vmem:[%s3988_s0 + $0x3f0] sm:$0xff]  ;;  %v345_v36 = vpack.c.bf16 %v153_v29, %v145_v28  ;;  %v188_v48 = vld [vmem:[%s3988_s0 + $0x4f8] sm:$0xff]  ;;  %v362_v51 = vpack.c.bf16 %v186_v45, %v178_v44  ;;  %v194_v57 = vld [vmem:[%s3988_s0 + $0x528] sm:$0xff] }
  0xae   :  { %v347_v37 = vpack.c.bf16 %v155_v31, %v147_v30  ;;  %v364_v52 = vpack.c.bf16 %v188_v48, %v180_v47  ;;  %v202_v58 = vld [vmem:[%s3988_s0 + $0x568] sm:$0xff]  ;;  %v196_v59 = vld [vmem:[%s3988_s0 + $0x538] sm:$0xff]  ;;  %v211_v17 = vld [vmem:[%s3988_s0 + $0x5b0] sm:$0xff] }
  0xaf   :  { %v204_v60 = vld [vmem:[%s3988_s0 + $0x578] sm:$0xff]  ;;  %v370_v63 = vpack.c.bf16 %v202_v58, %v194_v57  ;;  %v210_v6 = vld [vmem:[%s3988_s0 + $0x5a8] sm:$0xff]  ;;  %v219_v18 = vld [vmem:[%s3988_s0 + $0x5f0] sm:$0xff] }
  0xb0   :  { %v372_v0 = vpack.c.bf16 %v204_v60, %v196_v59  ;;  %v218_v7 = vld [vmem:[%s3988_s0 + $0x5e8] sm:$0xff]  ;;  %v212_v8 = vld [vmem:[%s3988_s0 + $0x5b8] sm:$0xff]  ;;  %v379_v32 = vpack.c.bf16 %v219_v18, %v211_v17  ;;  %v225_v45 = vld [vmem:[%s3988_s0 + $0x620] sm:$0xff] }
  0xb1   :  { %v220_v9 = vld [vmem:[%s3988_s0 + $0x5f8] sm:$0xff]  ;;  %v2684_v10 = vld [vmem:[%s3991_s3 + $0x8] sm:$0xff]   ;;  %v233_v47 = vld [vmem:[%s3988_s0 + $0x660] sm:$0xff] }
  0xb2   :  { %1344 = vmatmul.mubr.bf16.gmra.mrb[72].mxu0 %v305_v40  ;;  %v161_v40 = vld [vmem:[%s3988_s0 + $0x420] sm:$0xff]  ;;  %v226_v19 = vld [vmem:[%s3988_s0 + $0x628] sm:$0xff]  ;;  %v228_v22 = vld [vmem:[%s3988_s0 + $0x638] sm:$0xff]  ;;  %v385_v59 = vpack.c.bf16 %v233_v47, %v225_v45 }
  0xb3   :  { %1351 = vmatprep.mubr.bf16.mxu0 %v314_v42  ;;  %v163_v42 = vld [vmem:[%s3988_s0 + $0x430] sm:$0xff]  ;;  %v234_v20 = vld [vmem:[%s3988_s0 + $0x668] sm:$0xff]  ;;  %v236_v23 = vld [vmem:[%s3988_s0 + $0x678] sm:$0xff] }
  0xb4   :  { %1505 = vmatmul.mubr.bf16.gmra.mrb[72].mxu1 %v307_v41  ;;  %v169_v41 = vld [vmem:[%s3988_s0 + $0x460] sm:$0xff]  ;;  %v386_v33 = vpack.c.bf16 %v234_v20, %v226_v19  ;;  %v227_v48 = vld [vmem:[%s3988_s0 + $0x630] sm:$0xff]  ;;  %v260_v19 = vld [vmem:[%s3988_s0 + $0x738] sm:$0xff] }
  0xb5   :  { %2119 = vmatprep.mubr.msk.bf16.mxu1 %vm920_vm1, %v316_v43  ;;  %v171_v43 = vld [vmem:[%s3988_s0 + $0x470] sm:$0xff]  ;;  %v353_v49 = vpack.c.bf16 %v169_v41, %v161_v40  ;;  %v2687_v41 = vld [vmem:[%s3991_s3 + $0x20] sm:$0xff]   ;;  %v268_v20 = vld [vmem:[%s3988_s0 + $0x778] sm:$0xff] }
  0xb6   :  { %v355_v50 = vpack.c.bf16 %v171_v43, %v163_v42  ;;  %v267_v45 = vld [vmem:[%s3988_s0 + $0x770] sm:$0xff]  ;;  %v274_v47 = vld [vmem:[%s3988_s0 + $0x7a8] sm:$0xff] }
  0xba   :  { %1352 = vmatmul.mubr.bf16.gmra.mrb[76].mxu0 %v313_v53  ;;  %v177_v53 = vld [vmem:[%s3988_s0 + $0x4a0] sm:$0xff] }
  0xbb   :  { %1359 = vmatprep.mubr.bf16.mxu0 %v322_v55  ;;  %v179_v55 = vld [vmem:[%s3988_s0 + $0x4b0] sm:$0xff] }
  0xbc   :  { %1513 = vmatmul.mubr.bf16.gmra.mrb[76].mxu1 %v315_v54  ;;  %v185_v54 = vld [vmem:[%s3988_s0 + $0x4e0] sm:$0xff] }
  0xbd   :  { %2120 = vmatprep.mubr.msk.bf16.mxu1 %vm920_vm1, %v324_v56  ;;  %v187_v56 = vld [vmem:[%s3988_s0 + $0x4f0] sm:$0xff]  ;;  %v361_v61 = vpack.c.bf16 %v185_v54, %v177_v53  ;;  %v244_v54 = vld [vmem:[%s3988_s0 + $0x6b8] sm:$0xff] }
  0xbe   :  { %v363_v62 = vpack.c.bf16 %v187_v56, %v179_v55  ;;  %v252_v55 = vld [vmem:[%s3988_s0 + $0x6f8] sm:$0xff]  ;;  %v2688_v56 = vld [vmem:[%s3991_s3 + $0x28] sm:$0xff]  }
  0xc2   :  { %1360 = vmatmul.mubr.bf16.gmra.mrb[80].mxu0 %v321_v1  ;;  %v2683_v1 = vld [vmem:[%s3991_s3] sm:$0xff]  }
  0xc3   :  { %1367 = vmatprep.mubr.bf16.mxu0 %v330_v3  ;;  %v201_v3 = vld [vmem:[%s3988_s0 + $0x560] sm:$0xff]  ;;  %2537 = vmatprep.subr.bf16.mxu0 %v2683_v1 }
  0xc4   :  { %1521 = vmatmul.mubr.bf16.gmra.mrb[80].mxu1 %v323_v2  ;;  %v193_v2 = vld [vmem:[%s3988_s0 + $0x520] sm:$0xff]  ;;  %2538 = vmatpush3.bf16.msra.mxu0 %v2683_v1 }
  0xc5   :  { %2121 = vmatprep.mubr.msk.bf16.mxu1 %vm920_vm1, %v332_v4  ;;  %v195_v4 = vld [vmem:[%s3988_s0 + $0x530] sm:$0xff]  ;;  %v369_v11 = vpack.c.bf16 %v201_v3, %v193_v2  ;;  %2539 = vmatprep.subr.bf16.mxu0 %v2684_v10 }
  0xc6   :  { %v371_v12 = vpack.c.bf16 %v203_v5, %v195_v4  ;;  %v396_v4 = vpack.c.bf16 %v252_v55, %v244_v54 }
  0xc8   :  { %2540 = vmatpush3.bf16.msra.mxu0 %v2684_v10 }
  0xca   :  { %1368 = vmatmul.mubr.bf16.gmra.mrb[84].mxu0 %v329_v13  ;;  %v378_v13 = vpack.c.bf16 %v218_v7, %v210_v6 }
  0xcb   :  { %1375 = vmatprep.mubr.bf16.mxu0 %v338_v15  ;;  %v2685_v15 = vld [vmem:[%s3991_s3 + $0x10] sm:$0xff]  }
  0xcc   :  { %1529 = vmatmul.mubr.bf16.gmra.mrb[84].mxu1 %v331_v14  ;;  %v380_v14 = vpack.c.bf16 %v220_v9, %v212_v8  ;;  %2541 = vmatprep.subr.bf16.mxu0 %v2685_v15  ;;  %v2689_v8 = vld [vmem:[%s3991_s3 + $0x30] sm:$0xff]  }
  0xcd   :  { %2122 = vmatprep.mubr.msk.bf16.mxu1 %vm920_vm1, %v340_v46  ;;  %v209_v46 = vld [vmem:[%s3988_s0 + $0x5a0] sm:$0xff]  ;;  %2542 = vmatpush3.bf16.msra.mxu0 %v2685_v15  ;;  %v251_v15 = vld [vmem:[%s3988_s0 + $0x6f0] sm:$0xff] }
  0xce   :  { %v377_v28 = vpack.c.bf16 %v217_v16, %v209_v46  ;;  %v258_v46 = vld [vmem:[%s3988_s0 + $0x728] sm:$0xff] }
  0xcf   :  { %v266_v16 = vld [vmem:[%s3988_s0 + $0x768] sm:$0xff] }
  0xd2   :  { %1376 = vmatmul.mubr.bf16.gmra.mrb[88].mxu0 %v337_v24  ;;  %v2686_v24 = vld [vmem:[%s3991_s3 + $0x18] sm:$0xff]  }
  0xd3   :  { %1383 = vmatprep.mubr.bf16.mxu0 %v346_v26  ;;  %2543 = vmatprep.subr.bf16.mxu0 %v2686_v24 }
  0xd4   :  { %1537 = vmatmul.mubr.bf16.gmra.mrb[88].mxu1 %v339_v25  ;;  %v3681_v25 = vld [vmem:[%s3990_s2] ss:$0 sm:$0xff]  ;;  %2544 = vmatpush3.bf16.msra.mxu0 %v2686_v24 }
  0xd5   :  { %2123 = vmatprep.mubr.msk.bf16.mxu1 %vm920_vm1, %v348_v27  ;;  %2545 = vmatprep.subr.bf16.mxu0 %v2687_v41 }
  0xd8   :  { %2546 = vmatpush3.bf16.msra.mxu0 %v2687_v41  ;;  %v257_v41 = vld [vmem:[%s3988_s0 + $0x720] sm:$0xff] }
  0xd9   :  { %2547 = vmatprep.subr.bf16.mxu0 %v2688_v56 }
  0xda   :  { %1384 = vmatmul.mubr.bf16.gmra.mrb[92].mxu0 %v345_v36 }
  0xdb   :  { %1391 = vmatprep.mubr.bf16.mxu0 %v354_v38 }
  0xdc   :  { %1545 = vmatmul.mubr.bf16.gmra.mrb[92].mxu1 %v347_v37  ;;  %v388_v37 = vpack.c.bf16 %v236_v23, %v228_v22  ;;  %2548 = vmatpush3.bf16.msra.mxu0 %v2688_v56 }
  0xdd   :  { %2124 = vmatprep.mubr.msk.bf16.mxu1 %vm920_vm1, %v356_v39  ;;  %2549 = vmatprep.subr.bf16.mxu0 %v2689_v8 }
  0xe0   :  { %2550 = vmatpush3.bf16.msra.mxu0 %v2689_v8  ;;  %v273_v8 = vld [vmem:[%s3988_s0 + $0x7a0] sm:$0xff] }
  0xe2   :  { %1392 = vmatmul.mubr.bf16.gmra.mrb[96].mxu0 %v353_v49  ;;  %v235_v49 = vld [vmem:[%s3988_s0 + $0x670] sm:$0xff] }
  0xe3   :  { %1399 = vmatprep.mubr.bf16.mxu0 %v362_v51  ;;  %v250_v51 = vld [vmem:[%s3988_s0 + $0x6e8] sm:$0xff] }
  0xe4   :  { %1553 = vmatmul.mubr.bf16.gmra.mrb[96].mxu1 %v355_v50  ;;  %v242_v50 = vld [vmem:[%s3988_s0 + $0x6a8] sm:$0xff] }
  0xe5   :  { %2125 = vmatprep.mubr.msk.bf16.mxu1 %vm920_vm1, %v364_v52 }
  0xea   :  { %1400 = vmatmul.mubr.bf16.gmra.mrb[100].mxu0 %v361_v61 }
  0xeb   :  { %1407 = vmatprep.mubr.bf16.mxu0 %v370_v63  ;;  %v387_v63 = vpack.c.bf16 %v235_v49, %v227_v48  ;;  %v282_v48 = vld [vmem:[%s3988_s0 + $0x7e8] sm:$0xff] }
  0xec   :  { %1561 = vmatmul.mubr.bf16.gmra.mrb[100].mxu1 %v363_v62 }
  0xed   :  { %2126 = vmatprep.mubr.msk.bf16.mxu1 %vm920_vm1, %v372_v0  ;;  %v394_v0 = vpack.c.bf16 %v250_v51, %v242_v50  ;;  %v276_v51 = vld [vmem:[%s3988_s0 + $0x7b8] sm:$0xff] }
  0xf2   :  { %1408 = vmatmul.mubr.bf16.gmra.mrb[104].mxu0 %v369_v11 }
  0xf3   :  { %1415 = vmatprep.mubr.bf16.mxu0 %v378_v13  ;;  %v249_v13 = vld [vmem:[%s3988_s0 + $0x6e0] sm:$0xff] }
  0xf4   :  { %1569 = vmatmul.mubr.bf16.gmra.mrb[104].mxu1 %v371_v12  ;;  %v241_v12 = vld [vmem:[%s3988_s0 + $0x6a0] sm:$0xff] }
  0xf5   :  { %2127 = vmatprep.mubr.msk.bf16.mxu1 %vm920_vm1, %v380_v14  ;;  %v2159_v21 = vpop.f32.mrb[0].mxu0  ;;  %v243_v14 = vld [vmem:[%s3988_s0 + $0x6b0] sm:$0xff]  ;;  %v393_v24 = vpack.c.bf16 %v249_v13, %v241_v12 }
  0xf6   :  { %v2160_v26 = vpop.f32.mrb[1].mxu0  ;;  %v283_v12 = vld [vmem:[%s3988_s0 + $0x7f0] sm:$0xff] }
  0xf7   :  { %v2271_v27 = vpop.f32.mrb[0].mxu1  ;;  %v2161_v29 = vadd.f32 %v2160_v26, %v2159_v21  ;;  %v2162_v30 = vpop.f32.mrb[2].mxu0  ;;  %v2690_v21 = vld [vmem:[%s3991_s3 + $0x38] sm:$0xff]  }
  0xf8   :  { %v2272_v31 = vpop.f32.mrb[1].mxu1  ;;  %v2163_v34 = vpop.f32.mrb[3].mxu0  ;;  %2551 = vmatprep.subr.bf16.mxu0 %v2690_v21 }
  0xf9   :  { %v2273_v35 = vadd.f32 %v2272_v31, %v2271_v27  ;;  %v2274_v36 = vpop.f32.mrb[2].mxu1  ;;  %v1008_v38 = vadd.f32 %v2161_v29, %v3681_v25  ;;  %v2164_v39 = vadd.f32 %v2163_v34, %v2162_v30  ;;  %v395_v29 = vpack.c.bf16 %v251_v15, %v243_v14  ;;  %2552 = vmatpush3.bf16.msra.mxu0 %v2690_v21 }
  0xfa   :  { %v2275_v40 = vpop.f32.mrb[3].mxu1  ;;  %1416 = vmatmul.mubr.bf16.gmra.mrb[108].mxu0 %v377_v28  ;;  %v402_v30 = vpack.c.bf16 %v266_v16, %v258_v46  ;;  %v404_v34 = vpack.c.bf16 %v268_v20, %v260_v19 }
  0xfb   :  { %v2276_v42 = vadd.f32 %v2275_v40, %v2274_v36  ;;  %v1011_v43 = vadd.f32 %v2164_v39, %v3681_v25  ;;  %v3688_v44 = vadd.f32 %v2273_v35, %v1008_v38  ;;  %1423 = vmatprep.mubr.bf16.mxu0 %v386_v33 }
  0xfc   :  { %1577 = vmatmul.mubr.bf16.gmra.mrb[108].mxu1 %v379_v32 }
  0xfd   :  { %2128 = vmatprep.mubr.msk.bf16.mxu1 %vm920_vm1, %v388_v37  ;;  %v3709_v52 = vadd.f32 %v2276_v42, %v1011_v43  ;;  %v2165_v53 = vpop.f32.mrb[4].mxu0  ;;  %v265_v42 = vld [vmem:[%s3988_s0 + $0x760] sm:$0xff]  ;;  %v259_v43 = vld [vmem:[%s3988_s0 + $0x730] sm:$0xff] }
  0xfe   :  { %v2166_v57 = vpop.f32.mrb[5].mxu0  ;;  %v401_v56 = vpack.c.bf16 %v265_v42, %v257_v41 }
  0xff   :  { %v2277_v58 = vpop.f32.mrb[4].mxu1  ;;  %v2167_v60 = vadd.f32 %v2166_v57, %v2165_v53  ;;  %v2168_v61 = vpop.f32.mrb[6].mxu0  ;;  %v284_v53 = vld [vmem:[%s3988_s0 + $0x7f8] sm:$0xff] }
 0x100   :  { %v2278_v62 = vpop.f32.mrb[5].mxu1  ;;  %v2169_v1 = vpop.f32.mrb[7].mxu0 }
 0x101   :  { %v2279_v2 = vadd.f32 %v2278_v62, %v2277_v58  ;;  %v2280_v3 = vpop.f32.mrb[6].mxu1  ;;  %v1016_v5 = vadd.f32 %v2167_v60, %v3681_v25  ;;  %v2170_v6 = vadd.f32 %v2169_v1, %v2168_v61  ;;  %v403_v60 = vpack.c.bf16 %v267_v45, %v259_v43 }
 0x102   :  { %v2281_v7 = vpop.f32.mrb[7].mxu1  ;;  %1424 = vmatmul.mubr.bf16.gmra.mrb[112].mxu0 %v385_v59  ;;  %v410_v61 = vpack.c.bf16 %v282_v48, %v274_v47  ;;  %v412_v1 = vpack.c.bf16 %v284_v53, %v276_v51 }
 0x103   :  { %v2282_v9 = vadd.f32 %v2281_v7, %v2280_v3  ;;  %v1019_v10 = vadd.f32 %v2170_v6, %v3681_v25  ;;  %v3725_v11 = vadd.f32 %v2279_v2, %v1016_v5  ;;  %1431 = vmatprep.mubr.bf16.mxu0 %v394_v0 }
 0x104   :  { %1585 = vmatmul.mubr.bf16.gmra.mrb[112].mxu1 %v387_v63 }
 0x105   :  { %2129 = vmatprep.mubr.msk.bf16.mxu1 %vm920_vm1, %v396_v4  ;;  %v3746_v17 = vadd.f32 %v2282_v9, %v1019_v10  ;;  %v2171_v18 = vpop.f32.mrb[8].mxu0  ;;  %v281_v9 = vld [vmem:[%s3988_s0 + $0x7e0] sm:$0xff]  ;;  %v275_v10 = vld [vmem:[%s3988_s0 + $0x7b0] sm:$0xff] }
 0x106   :  { %v2172_v22 = vpop.f32.mrb[9].mxu0  ;;  %v409_v16 = vpack.c.bf16 %v281_v9, %v273_v8  ;;  %v411_v21 = vpack.c.bf16 %v283_v12, %v275_v10 }
 0x107   :  { %v2283_v23 = vpop.f32.mrb[8].mxu1  ;;  %v2173_v26 = vadd.f32 %v2172_v22, %v2171_v18  ;;  %v2174_v27 = vpop.f32.mrb[10].mxu0 }
 0x108   :  { %v2284_v28 = vpop.f32.mrb[9].mxu1  ;;  %v2175_v31 = vpop.f32.mrb[11].mxu0 }
 0x109   :  { %v2285_v32 = vadd.f32 %v2284_v28, %v2283_v23  ;;  %v2286_v33 = vpop.f32.mrb[10].mxu1  ;;  %v1024_v35 = vadd.f32 %v2173_v26, %v3681_v25  ;;  %v2176_v36 = vadd.f32 %v2175_v31, %v2174_v27 }
 0x10a   :  { %v2287_v37 = vpop.f32.mrb[11].mxu1  ;;  %1432 = vmatmul.mubr.bf16.gmra.mrb[116].mxu0 %v393_v24 }
 0x10b   :  { %v2288_v38 = vadd.f32 %v2287_v37, %v2286_v33  ;;  %v1027_v39 = vadd.f32 %v2176_v36, %v3681_v25  ;;  %v3759_v40 = vadd.f32 %v2285_v32, %v1024_v35  ;;  %1439 = vmatprep.mubr.bf16.mxu0 %v402_v30 }
 0x10c   :  { %1593 = vmatmul.mubr.bf16.gmra.mrb[116].mxu1 %v395_v29 }
 0x10d   :  { %2130 = vmatprep.mubr.msk.bf16.mxu1 %vm920_vm1, %v404_v34  ;;  %v3780_v49 = vadd.f32 %v2288_v38, %v1027_v39  ;;  %v2177_v50 = vpop.f32.mrb[12].mxu0 }
 0x10e   :  { %v2178_v54 = vpop.f32.mrb[13].mxu0 }
 0x10f   :  { %v2289_v55 = vpop.f32.mrb[12].mxu1  ;;  %v2179_v57 = vadd.f32 %v2178_v54, %v2177_v50  ;;  %v2180_v58 = vpop.f32.mrb[14].mxu0 }
 0x110   :  { %v2290_v59 = vpop.f32.mrb[13].mxu1  ;;  %v2181_v62 = vpop.f32.mrb[15].mxu0 }
 0x111   :  { %v2291_v63 = vadd.f32 %v2290_v59, %v2289_v55  ;;  %v2292_v0 = vpop.f32.mrb[14].mxu1  ;;  %v1032_v2 = vadd.f32 %v2179_v57, %v3681_v25  ;;  %v2182_v3 = vadd.f32 %v2181_v62, %v2180_v58 }
 0x112   :  { %v2293_v4 = vpop.f32.mrb[15].mxu1  ;;  %1440 = vmatmul.mubr.bf16.gmra.mrb[120].mxu0 %v401_v56 }
 0x113   :  { %v2294_v5 = vadd.f32 %v2293_v4, %v2292_v0  ;;  %v1035_v6 = vadd.f32 %v2182_v3, %v3681_v25  ;;  %v3790_v7 = vadd.f32 %v2291_v63, %v1032_v2  ;;  %1447 = vmatprep.mubr.bf16.mxu0 %v410_v61 }
 0x114   :  { %1601 = vmatmul.mubr.bf16.gmra.mrb[120].mxu1 %v403_v60 }
 0x115   :  { %2131 = vmatprep.mubr.msk.bf16.mxu1 %vm920_vm1, %v412_v1  ;;  %v3805_v13 = vadd.f32 %v2294_v5, %v1035_v6  ;;  %v2183_v14 = vpop.f32.mrb[16].mxu0 }
 0x116   :  { %v2184_v15 = vpop.f32.mrb[17].mxu0 }
 0x117   :  { %v2295_v46 = vpop.f32.mrb[16].mxu1  ;;  %v2185_v18 = vadd.f32 %v2184_v15, %v2183_v14  ;;  %v2186_v19 = vpop.f32.mrb[18].mxu0 }
 0x118   :  { %v2296_v20 = vpop.f32.mrb[17].mxu1  ;;  %v2187_v22 = vpop.f32.mrb[19].mxu0 }
 0x119   :  { %v2297_v23 = vadd.f32 %v2296_v20, %v2295_v46  ;;  %v2298_v24 = vpop.f32.mrb[18].mxu1  ;;  %v1040_v26 = vadd.f32 %v2185_v18, %v3681_v25  ;;  %v2188_v27 = vadd.f32 %v2187_v22, %v2186_v19 }
 0x11a   :  { %v2299_v28 = vpop.f32.mrb[19].mxu1  ;;  %1448 = vmatmul.mubr.bf16.gmra.mrb[124].mxu0 %v409_v16 }
 0x11b   :  { %v2300_v29 = vadd.f32 %v2299_v28, %v2298_v24  ;;  %v1043_v30 = vadd.f32 %v2188_v27, %v3681_v25  ;;  %v3809_v31 = vadd.f32 %v2297_v23, %v1040_v26 }
 0x11c   :  { %1609 = vmatmul.mubr.bf16.gmra.mrb[124].mxu1 %v411_v21 }
 0x11d   :  { %v3811_v32 = vadd.f32 %v2300_v29, %v1043_v30  ;;  %v2189_v33 = vpop.f32.mrb[20].mxu0 }
 0x11e   :  { %v2190_v34 = vpop.f32.mrb[21].mxu0 }
 0x11f   :  { %v2301_v35 = vpop.f32.mrb[20].mxu1  ;;  %v2191_v36 = vadd.f32 %v2190_v34, %v2189_v33  ;;  %v2192_v37 = vpop.f32.mrb[22].mxu0 }
 0x120   :  { %v2302_v38 = vpop.f32.mrb[21].mxu1  ;;  %v2193_v39 = vpop.f32.mrb[23].mxu0 }
 0x121   :  { %v2303_v41 = vadd.f32 %v2302_v38, %v2301_v35  ;;  %v2304_v42 = vpop.f32.mrb[22].mxu1  ;;  %v1048_v43 = vadd.f32 %v2191_v36, %v3681_v25  ;;  %v2194_v45 = vadd.f32 %v2193_v39, %v2192_v37 }
 0x122   :  { %v2305_v47 = vpop.f32.mrb[23].mxu1 }
 0x123   :  { %v2306_v48 = vadd.f32 %v2305_v47, %v2304_v42  ;;  %v1051_v50 = vadd.f32 %v2194_v45, %v3681_v25  ;;  %v3815_v51 = vadd.f32 %v2303_v41, %v1048_v43 }
 0x125   :  { %v3817_v53 = vadd.f32 %v2306_v48, %v1051_v50  ;;  %v2195_v54 = vpop.f32.mrb[24].mxu0 }
 0x126   :  { %v2196_v55 = vpop.f32.mrb[25].mxu0 }
 0x127   :  { %v2307_v56 = vpop.f32.mrb[24].mxu1  ;;  %v2197_v57 = vadd.f32 %v2196_v55, %v2195_v54  ;;  %v2198_v58 = vpop.f32.mrb[26].mxu0 }
 0x128   :  { %v2308_v59 = vpop.f32.mrb[25].mxu1  ;;  %v2199_v60 = vpop.f32.mrb[27].mxu0 }
 0x129   :  { %v2309_v61 = vadd.f32 %v2308_v59, %v2307_v56  ;;  %v2310_v62 = vpop.f32.mrb[26].mxu1  ;;  %v1056_v63 = vadd.f32 %v2197_v57, %v3681_v25  ;;  %v2200_v0 = vadd.f32 %v2199_v60, %v2198_v58 }
 0x12a   :  { %v2311_v1 = vpop.f32.mrb[27].mxu1 }
 0x12b   :  { %v2312_v2 = vadd.f32 %v2311_v1, %v2310_v62  ;;  %v1059_v3 = vadd.f32 %v2200_v0, %v3681_v25  ;;  %v3821_v4 = vadd.f32 %v2309_v61, %v1056_v63 }
 0x12d   :  { %v3823_v5 = vadd.f32 %v2312_v2, %v1059_v3  ;;  %v2201_v6 = vpop.f32.mrb[28].mxu0 }
 0x12e   :  { %v2202_v8 = vpop.f32.mrb[29].mxu0 }
 0x12f   :  { %v2313_v9 = vpop.f32.mrb[28].mxu1  ;;  %v2203_v10 = vadd.f32 %v2202_v8, %v2201_v6  ;;  %v2204_v12 = vpop.f32.mrb[30].mxu0 }
 0x130   :  { %v2314_v14 = vpop.f32.mrb[29].mxu1  ;;  %v2205_v15 = vpop.f32.mrb[31].mxu0 }
 0x131   :  { %v2315_v46 = vadd.f32 %v2314_v14, %v2313_v9  ;;  %v2316_v16 = vpop.f32.mrb[30].mxu1  ;;  %v1064_v18 = vadd.f32 %v2203_v10, %v3681_v25  ;;  %v2206_v19 = vadd.f32 %v2205_v15, %v2204_v12 }
 0x132   :  { %v2317_v20 = vpop.f32.mrb[31].mxu1 }
 0x133   :  { %v2318_v21 = vadd.f32 %v2317_v20, %v2316_v16  ;;  %v1067_v22 = vadd.f32 %v2206_v19, %v3681_v25  ;;  %v3827_v23 = vadd.f32 %v2315_v46, %v1064_v18 }
 0x135   :  { %v3829_v24 = vadd.f32 %v2318_v21, %v1067_v22  ;;  %v2207_v26 = vpop.f32.mrb[32].mxu0 }
 0x136   :  { %v2208_v27 = vpop.f32.mrb[33].mxu0 }
 0x137   :  { %v2319_v28 = vpop.f32.mrb[32].mxu1  ;;  %v2209_v29 = vadd.f32 %v2208_v27, %v2207_v26  ;;  %v2210_v30 = vpop.f32.mrb[34].mxu0 }
 0x138   :  { %v2320_v33 = vpop.f32.mrb[33].mxu1  ;;  %v2211_v34 = vpop.f32.mrb[35].mxu0 }
 0x139   :  { %v2321_v35 = vadd.f32 %v2320_v33, %v2319_v28  ;;  %v2322_v36 = vpop.f32.mrb[34].mxu1  ;;  %v1072_v37 = vadd.f32 %v2209_v29, %v3681_v25  ;;  %v2212_v38 = vadd.f32 %v2211_v34, %v2210_v30 }
 0x13a   :  { %v2323_v39 = vpop.f32.mrb[35].mxu1 }
 0x13b   :  { %v2324_v41 = vadd.f32 %v2323_v39, %v2322_v36  ;;  %v1075_v42 = vadd.f32 %v2212_v38, %v3681_v25  ;;  %v3833_v43 = vadd.f32 %v2321_v35, %v1072_v37 }
 0x13d   :  { %v3835_v45 = vadd.f32 %v2324_v41, %v1075_v42  ;;  %v2213_v47 = vpop.f32.mrb[36].mxu0 }
 0x13e   :  { %v2214_v48 = vpop.f32.mrb[37].mxu0 }
 0x13f   :  { %v2325_v50 = vpop.f32.mrb[36].mxu1  ;;  %v2215_v54 = vadd.f32 %v2214_v48, %v2213_v47  ;;  %v2216_v55 = vpop.f32.mrb[38].mxu0 }
 0x140   :  { %v2326_v56 = vpop.f32.mrb[37].mxu1  ;;  %v2217_v57 = vpop.f32.mrb[39].mxu0 }
 0x141   :  { %v2327_v58 = vadd.f32 %v2326_v56, %v2325_v50  ;;  %v2328_v59 = vpop.f32.mrb[38].mxu1  ;;  %v1080_v60 = vadd.f32 %v2215_v54, %v3681_v25  ;;  %v2218_v61 = vadd.f32 %v2217_v57, %v2216_v55 }
 0x142   :  { %v2329_v62 = vpop.f32.mrb[39].mxu1 }
 0x143   :  { %v2330_v63 = vadd.f32 %v2329_v62, %v2328_v59  ;;  %v1083_v0 = vadd.f32 %v2218_v61, %v3681_v25  ;;  %v3839_v1 = vadd.f32 %v2327_v58, %v1080_v60 }
 0x145   :  { %v3841_v2 = vadd.f32 %v2330_v63, %v1083_v0  ;;  %v2219_v3 = vpop.f32.mrb[40].mxu0 }
 0x146   :  { %v2220_v6 = vpop.f32.mrb[41].mxu0 }
 0x147   :  { %v2331_v8 = vpop.f32.mrb[40].mxu1  ;;  %v2221_v9 = vadd.f32 %v2220_v6, %v2219_v3  ;;  %v2222_v10 = vpop.f32.mrb[42].mxu0 }
 0x148   :  { %v2332_v12 = vpop.f32.mrb[41].mxu1  ;;  %v2223_v14 = vpop.f32.mrb[43].mxu0 }
 0x149   :  { %v2333_v15 = vadd.f32 %v2332_v12, %v2331_v8  ;;  %v2334_v46 = vpop.f32.mrb[42].mxu1  ;;  %v1088_v16 = vadd.f32 %v2221_v9, %v3681_v25  ;;  %v2224_v18 = vadd.f32 %v2223_v14, %v2222_v10 }
 0x14a   :  { %v2335_v19 = vpop.f32.mrb[43].mxu1 }
 0x14b   :  { %v2336_v20 = vadd.f32 %v2335_v19, %v2334_v46  ;;  %v1091_v21 = vadd.f32 %v2224_v18, %v3681_v25  ;;  %v3845_v22 = vadd.f32 %v2333_v15, %v1088_v16 }
 0x14d   :  { %v3847_v26 = vadd.f32 %v2336_v20, %v1091_v21  ;;  %v2225_v27 = vpop.f32.mrb[44].mxu0 }
 0x14e   :  { %v2226_v28 = vpop.f32.mrb[45].mxu0 }
 0x14f   :  { %v2337_v29 = vpop.f32.mrb[44].mxu1  ;;  %v2227_v30 = vadd.f32 %v2226_v28, %v2225_v27  ;;  %v2228_v33 = vpop.f32.mrb[46].mxu0 }
 0x150   :  { %v2338_v34 = vpop.f32.mrb[45].mxu1  ;;  %v2229_v35 = vpop.f32.mrb[47].mxu0 }
 0x151   :  { %v2339_v36 = vadd.f32 %v2338_v34, %v2337_v29  ;;  %v2340_v37 = vpop.f32.mrb[46].mxu1  ;;  %v1096_v38 = vadd.f32 %v2227_v30, %v3681_v25  ;;  %v2230_v39 = vadd.f32 %v2229_v35, %v2228_v33 }
 0x152   :  { %v2341_v41 = vpop.f32.mrb[47].mxu1 }
 0x153   :  { %v2342_v42 = vadd.f32 %v2341_v41, %v2340_v37  ;;  %v1099_v47 = vadd.f32 %v2230_v39, %v3681_v25  ;;  %v3851_v48 = vadd.f32 %v2339_v36, %v1096_v38 }
 0x155   :  { %v3853_v50 = vadd.f32 %v2342_v42, %v1099_v47  ;;  %v2231_v54 = vpop.f32.mrb[48].mxu0 }
 0x156   :  { %v2232_v55 = vpop.f32.mrb[49].mxu0 }
 0x157   :  { %v2343_v56 = vpop.f32.mrb[48].mxu1  ;;  %v2233_v57 = vadd.f32 %v2232_v55, %v2231_v54  ;;  %v2234_v58 = vpop.f32.mrb[50].mxu0 }
 0x158   :  { %v2344_v59 = vpop.f32.mrb[49].mxu1  ;;  %v2235_v60 = vpop.f32.mrb[51].mxu0 }
 0x159   :  { %v2345_v61 = vadd.f32 %v2344_v59, %v2343_v56  ;;  %v2346_v62 = vpop.f32.mrb[50].mxu1  ;;  %v1104_v63 = vadd.f32 %v2233_v57, %v3681_v25  ;;  %v2236_v0 = vadd.f32 %v2235_v60, %v2234_v58 }
 0x15a   :  { %v2347_v3 = vpop.f32.mrb[51].mxu1 }
 0x15b   :  { %v2348_v6 = vadd.f32 %v2347_v3, %v2346_v62  ;;  %v1107_v8 = vadd.f32 %v2236_v0, %v3681_v25  ;;  %v3857_v9 = vadd.f32 %v2345_v61, %v1104_v63 }
 0x15d   :  { %v3859_v10 = vadd.f32 %v2348_v6, %v1107_v8  ;;  %v2237_v12 = vpop.f32.mrb[52].mxu0 }
 0x15e   :  { %v2238_v14 = vpop.f32.mrb[53].mxu0 }
 0x15f   :  { %v2349_v15 = vpop.f32.mrb[52].mxu1  ;;  %v2239_v46 = vadd.f32 %v2238_v14, %v2237_v12  ;;  %v2240_v16 = vpop.f32.mrb[54].mxu0 }
 0x160   :  { %v2350_v18 = vpop.f32.mrb[53].mxu1  ;;  %v2241_v19 = vpop.f32.mrb[55].mxu0 }
 0x161   :  { %v2351_v20 = vadd.f32 %v2350_v18, %v2349_v15  ;;  %v2352_v21 = vpop.f32.mrb[54].mxu1  ;;  %v1112_v27 = vadd.f32 %v2239_v46, %v3681_v25  ;;  %v2242_v28 = vadd.f32 %v2241_v19, %v2240_v16 }
 0x162   :  { %v2353_v29 = vpop.f32.mrb[55].mxu1 }
 0x163   :  { %v2354_v30 = vadd.f32 %v2353_v29, %v2352_v21  ;;  %v1115_v33 = vadd.f32 %v2242_v28, %v3681_v25  ;;  %v3863_v34 = vadd.f32 %v2351_v20, %v1112_v27 }
 0x165   :  { %v3865_v35 = vadd.f32 %v2354_v30, %v1115_v33  ;;  %v2243_v36 = vpop.f32.mrb[56].mxu0 }
 0x166   :  { %v2244_v37 = vpop.f32.mrb[57].mxu0 }
 0x167   :  { %v2355_v38 = vpop.f32.mrb[56].mxu1  ;;  %v2245_v39 = vadd.f32 %v2244_v37, %v2243_v36  ;;  %v2246_v41 = vpop.f32.mrb[58].mxu0 }
 0x168   :  { %v2356_v42 = vpop.f32.mrb[57].mxu1  ;;  %v2247_v47 = vpop.f32.mrb[59].mxu0 }
 0x169   :  { %v2357_v54 = vadd.f32 %v2356_v42, %v2355_v38  ;;  %v2358_v55 = vpop.f32.mrb[58].mxu1  ;;  %v1120_v56 = vadd.f32 %v2245_v39, %v3681_v25  ;;  %v2248_v57 = vadd.f32 %v2247_v47, %v2246_v41 }
 0x16a   :  { %v2359_v58 = vpop.f32.mrb[59].mxu1 }
 0x16b   :  { %v2360_v59 = vadd.f32 %v2359_v58, %v2358_v55  ;;  %v1123_v60 = vadd.f32 %v2248_v57, %v3681_v25  ;;  %v3869_v61 = vadd.f32 %v2357_v54, %v1120_v56 }
 0x16d   :  { %v3871_v62 = vadd.f32 %v2360_v59, %v1123_v60  ;;  %v2249_v63 = vpop.f32.mrb[60].mxu0 }
 0x16e   :  { %v2250_v0 = vpop.f32.mrb[61].mxu0 }
 0x16f   :  { %v2361_v3 = vpop.f32.mrb[60].mxu1  ;;  %v2251_v6 = vadd.f32 %v2250_v0, %v2249_v63  ;;  %v2252_v8 = vpop.f32.mrb[62].mxu0 }
 0x170   :  { %v2362_v12 = vpop.f32.mrb[61].mxu1  ;;  %v2253_v14 = vpop.f32.mrb[63].mxu0 }
 0x171   :  { %v2363_v15 = vadd.f32 %v2362_v12, %v2361_v3  ;;  %v2364_v46 = vpop.f32.mrb[62].mxu1  ;;  %v1128_v16 = vadd.f32 %v2251_v6, %v3681_v25  ;;  %v2254_v18 = vadd.f32 %v2253_v14, %v2252_v8 }
 0x172   :  { %v2365_v19 = vpop.f32.mrb[63].mxu1 }
 0x173   :  { %v2366_v20 = vadd.f32 %v2365_v19, %v2364_v46  ;;  %v1131_v21 = vadd.f32 %v2254_v18, %v3681_v25  ;;  %v3875_v27 = vadd.f32 %v2363_v15, %v1128_v16 }
 0x175   :  { %v3877_v28 = vadd.f32 %v2366_v20, %v1131_v21  ;;  %v2383_v29 = vpop.f32.mrb[64].mxu0 }
 0x176   :  { %v2384_v30 = vpop.f32.mrb[65].mxu0 }
 0x177   :  { %v1490_v33 = vpop.f32.mrb[64].mxu1  ;;  %v2385_v36 = vadd.f32 %v2384_v30, %v2383_v29  ;;  %v2386_v37 = vpop.f32.mrb[66].mxu0 }
 0x178   :  { %v1492_v38 = vpop.f32.mrb[65].mxu1  ;;  %v2387_v39 = vpop.f32.mrb[67].mxu0 }
 0x179   :  { %v1493_v41 = vpop.f32.mrb[66].mxu1  ;;  %v1330_v42 = vadd.f32 %v2385_v36, %v3688_v44  ;;  %v2388_v47 = vadd.f32 %v2387_v39, %v2386_v37 }
 0x17a   :  { %v1495_v54 = vpop.f32.mrb[67].mxu1 }
 0x17b   :  { %v1491_v55 = vadd.f32 %v1490_v33, %v1330_v42  ;;  %v1333_v56 = vadd.f32 %v2388_v47, %v3709_v52 }
 0x17d   :  { %v1494_v25 = vadd.f32 %v1493_v41, %v1333_v56  ;;  %v2389_v57 = vpop.f32.mrb[68].mxu0  ;;  %v1617_v60 = vmax.f32 %v1491_v55, 0.0 }
 0x17e   :  { %v2390_v58 = vpop.f32.mrb[69].mxu0 }
 0x17f   :  { %v1498_v59 = vpop.f32.mrb[68].mxu1  ;;  %v1618_v63 = vmax.f32 %v1494_v25, 0.0  ;;  %v2391_v0 = vadd.f32 %v2390_v58, %v2389_v57  ;;  %v2392_v3 = vpop.f32.mrb[70].mxu0 }
 0x180   :  { %v1500_v6 = vpop.f32.mrb[69].mxu1  ;;  %v2393_v8 = vpop.f32.mrb[71].mxu0 }
 0x181   :  { %v1501_v12 = vpop.f32.mrb[70].mxu1  ;;  %v1649_v14 = vpack.c.bf16 %v1618_v63, %v1617_v60  ;;  %v1338_v15 = vadd.f32 %v2391_v0, %v3725_v11  ;;  %v2394_v44 = vadd.f32 %v2393_v8, %v2392_v3 }
 0x182   :  { %v1503_v46 = vpop.f32.mrb[71].mxu1 }
 0x183   :  { %v1499_v16 = vadd.f32 %v1498_v59, %v1338_v15  ;;  %v1341_v18 = vadd.f32 %v2394_v44, %v3746_v17  ;;  %2553 = vmatprep.mubr.bf16.mxu0 %v1649_v14 }
 0x185   :  { %v1502_v52 = vadd.f32 %v1501_v12, %v1341_v18  ;;  %v2395_v19 = vpop.f32.mrb[72].mxu0  ;;  %v1619_v29 = vmax.f32 %v1499_v16, 0.0 }
 0x186   :  { %v2396_v20 = vpop.f32.mrb[73].mxu0 }
 0x187   :  { %v1506_v21 = vpop.f32.mrb[72].mxu1  ;;  %v1620_v30 = vmax.f32 %v1502_v52, 0.0  ;;  %v2397_v33 = vadd.f32 %v2396_v20, %v2395_v19  ;;  %v2398_v36 = vpop.f32.mrb[74].mxu0 }
 0x188   :  { %v1508_v37 = vpop.f32.mrb[73].mxu1  ;;  %v2399_v38 = vpop.f32.mrb[75].mxu0 }
 0x189   :  { %v1509_v39 = vpop.f32.mrb[74].mxu1  ;;  %v1650_v41 = vpack.c.bf16 %v1620_v30, %v1619_v29  ;;  %v1346_v11 = vadd.f32 %v2397_v33, %v3759_v40  ;;  %v2400_v42 = vadd.f32 %v2399_v38, %v2398_v36 }
 0x18a   :  { %v1511_v47 = vpop.f32.mrb[75].mxu1 }
 0x18b   :  { %v1507_v54 = vadd.f32 %v1506_v21, %v1346_v11  ;;  %v1349_v17 = vadd.f32 %v2400_v42, %v3780_v49  ;;  %2554 = vmatmul.mubr.bf16.vlgmr.msra.gmra.mrb[128].mxu0 %v1650_v41 }
 0x18d   :  { %v1510_v55 = vadd.f32 %v1509_v39, %v1349_v17  ;;  %v2401_v56 = vpop.f32.mrb[76].mxu0  ;;  %v1621_v58 = vmax.f32 %v1507_v54, 0.0 }
 0x18e   :  { %v2402_v25 = vpop.f32.mrb[77].mxu0 }
 0x18f   :  { %v1514_v57 = vpop.f32.mrb[76].mxu1  ;;  %v1622_v59 = vmax.f32 %v1510_v55, 0.0  ;;  %v2403_v60 = vadd.f32 %v2402_v25, %v2401_v56  ;;  %v2404_v63 = vpop.f32.mrb[78].mxu0 }
 0x190   :  { %v1516_v0 = vpop.f32.mrb[77].mxu1  ;;  %v2405_v3 = vpop.f32.mrb[79].mxu0 }
 0x191   :  { %v1517_v6 = vpop.f32.mrb[78].mxu1  ;;  %v1651_v8 = vpack.c.bf16 %v1622_v59, %v1621_v58  ;;  %v1354_v40 = vadd.f32 %v2403_v60, %v3790_v7  ;;  %v2406_v12 = vadd.f32 %v2405_v3, %v2404_v63 }
 0x192   :  { %v1519_v14 = vpop.f32.mrb[79].mxu1 }
 0x193   :  { %v1515_v15 = vadd.f32 %v1514_v57, %v1354_v40  ;;  %v1357_v49 = vadd.f32 %v2406_v12, %v3805_v13  ;;  %2557 = vmatprep.mubr.bf16.mxu0 %v1651_v8 }
 0x195   :  { %v1518_v44 = vadd.f32 %v1517_v6, %v1357_v49  ;;  %v2407_v46 = vpop.f32.mrb[80].mxu0  ;;  %v1623_v52 = vmax.f32 %v1515_v15, 0.0 }
 0x196   :  { %v2408_v16 = vpop.f32.mrb[81].mxu0 }
 0x197   :  { %v1522_v18 = vpop.f32.mrb[80].mxu1  ;;  %v1624_v19 = vmax.f32 %v1518_v44, 0.0  ;;  %v2409_v20 = vadd.f32 %v2408_v16, %v2407_v46  ;;  %v2410_v21 = vpop.f32.mrb[82].mxu0 }
 0x198   :  { %v1524_v29 = vpop.f32.mrb[81].mxu1  ;;  %v2411_v30 = vpop.f32.mrb[83].mxu0 }
 0x199   :  { %v1525_v33 = vpop.f32.mrb[82].mxu1  ;;  %v1652_v36 = vpack.c.bf16 %v1624_v19, %v1623_v52  ;;  %v1362_v7 = vadd.f32 %v2409_v20, %v3809_v31  ;;  %v2412_v37 = vadd.f32 %v2411_v30, %v2410_v21 }
 0x19a   :  { %v1527_v38 = vpop.f32.mrb[83].mxu1 }
 0x19b   :  { %v1523_v39 = vadd.f32 %v1522_v18, %v1362_v7  ;;  %v1365_v13 = vadd.f32 %v2412_v37, %v3811_v32  ;;  %2558 = vmatmul.mubr.bf16.gmra.mrb[132].mxu0 %v1652_v36 }
 0x19d   :  { %v1526_v41 = vadd.f32 %v1525_v33, %v1365_v13  ;;  %v2413_v11 = vpop.f32.mrb[84].mxu0  ;;  %v1625_v54 = vmax.f32 %v1523_v39, 0.0 }
 0x19e   :  { %v2414_v42 = vpop.f32.mrb[85].mxu0 }
 0x19f   :  { %v1530_v47 = vpop.f32.mrb[84].mxu1  ;;  %v1626_v17 = vmax.f32 %v1526_v41, 0.0  ;;  %v2415_v55 = vadd.f32 %v2414_v42, %v2413_v11  ;;  %v2416_v56 = vpop.f32.mrb[86].mxu0 }
 0x1a0   :  { %v1532_v25 = vpop.f32.mrb[85].mxu1  ;;  %v2417_v57 = vpop.f32.mrb[87].mxu0 }
 0x1a1   :  { %v1533_v58 = vpop.f32.mrb[86].mxu1  ;;  %v1653_v59 = vpack.c.bf16 %v1626_v17, %v1625_v54  ;;  %v1370_v31 = vadd.f32 %v2415_v55, %v3815_v51  ;;  %v2418_v60 = vadd.f32 %v2417_v57, %v2416_v56 }
 0x1a2   :  { %v1535_v63 = vpop.f32.mrb[87].mxu1 }
 0x1a3   :  { %v1531_v0 = vadd.f32 %v1530_v47, %v1370_v31  ;;  %v1373_v32 = vadd.f32 %v2418_v60, %v3817_v53  ;;  %2561 = vmatprep.mubr.bf16.mxu0 %v1653_v59 }
 0x1a5   :  { %v1534_v3 = vadd.f32 %v1533_v58, %v1373_v32  ;;  %v2419_v6 = vpop.f32.mrb[88].mxu0  ;;  %v1627_v12 = vmax.f32 %v1531_v0, 0.0 }
 0x1a6   :  { %v2420_v8 = vpop.f32.mrb[89].mxu0 }
 0x1a7   :  { %v1538_v40 = vpop.f32.mrb[88].mxu1  ;;  %v1628_v14 = vmax.f32 %v1534_v3, 0.0  ;;  %v2421_v15 = vadd.f32 %v2420_v8, %v2419_v6  ;;  %v2422_v49 = vpop.f32.mrb[90].mxu0 }
 0x1a8   :  { %v1540_v44 = vpop.f32.mrb[89].mxu1  ;;  %v2423_v46 = vpop.f32.mrb[91].mxu0 }
 0x1a9   :  { %v1541_v16 = vpop.f32.mrb[90].mxu1  ;;  %v1654_v18 = vpack.c.bf16 %v1628_v14, %v1627_v12  ;;  %v1378_v51 = vadd.f32 %v2421_v15, %v3821_v4  ;;  %v2424_v52 = vadd.f32 %v2423_v46, %v2422_v49 }
 0x1aa   :  { %v1543_v19 = vpop.f32.mrb[91].mxu1 }
 0x1ab   :  { %v1539_v20 = vadd.f32 %v1538_v40, %v1378_v51  ;;  %v1381_v53 = vadd.f32 %v2424_v52, %v3823_v5  ;;  %2562 = vmatmul.mubr.bf16.gmra.mrb[136].mxu0 %v1654_v18 }
 0x1ad   :  { %v1542_v21 = vadd.f32 %v1541_v16, %v1381_v53  ;;  %v2425_v29 = vpop.f32.mrb[92].mxu0  ;;  %v1629_v36 = vmax.f32 %v1539_v20, 0.0 }
 0x1ae   :  { %v2426_v30 = vpop.f32.mrb[93].mxu0 }
 0x1af   :  { %v1546_v33 = vpop.f32.mrb[92].mxu1  ;;  %v1630_v7 = vmax.f32 %v1542_v21, 0.0  ;;  %v2427_v37 = vadd.f32 %v2426_v30, %v2425_v29  ;;  %v2428_v38 = vpop.f32.mrb[94].mxu0 }
 0x1b0   :  { %v1548_v39 = vpop.f32.mrb[93].mxu1  ;;  %v2429_v13 = vpop.f32.mrb[95].mxu0 }
 0x1b1   :  { %v1549_v41 = vpop.f32.mrb[94].mxu1  ;;  %v1655_v11 = vpack.c.bf16 %v1630_v7, %v1629_v36  ;;  %v1386_v4 = vadd.f32 %v2427_v37, %v3827_v23  ;;  %v2430_v42 = vadd.f32 %v2429_v13, %v2428_v38 }
 0x1b2   :  { %v1551_v47 = vpop.f32.mrb[95].mxu1 }
 0x1b3   :  { %v1547_v54 = vadd.f32 %v1546_v33, %v1386_v4  ;;  %v1389_v5 = vadd.f32 %v2430_v42, %v3829_v24  ;;  %2565 = vmatprep.mubr.bf16.mxu0 %v1655_v11 }
 0x1b5   :  { %v1550_v17 = vadd.f32 %v1549_v41, %v1389_v5  ;;  %v2431_v55 = vpop.f32.mrb[96].mxu0  ;;  %v1631_v57 = vmax.f32 %v1547_v54, 0.0 }
 0x1b6   :  { %v2432_v56 = vpop.f32.mrb[97].mxu0 }
 0x1b7   :  { %v1554_v25 = vpop.f32.mrb[96].mxu1  ;;  %v1632_v58 = vmax.f32 %v1550_v17, 0.0  ;;  %v2433_v59 = vadd.f32 %v2432_v56, %v2431_v55  ;;  %v2434_v31 = vpop.f32.mrb[98].mxu0 }
 0x1b8   :  { %v1556_v60 = vpop.f32.mrb[97].mxu1  ;;  %v2435_v63 = vpop.f32.mrb[99].mxu0 }
 0x1b9   :  { %v1557_v0 = vpop.f32.mrb[98].mxu1  ;;  %v1656_v32 = vpack.c.bf16 %v1632_v58, %v1631_v57  ;;  %v1394_v23 = vadd.f32 %v2433_v59, %v3833_v43  ;;  %v2436_v3 = vadd.f32 %v2435_v63, %v2434_v31 }
 0x1ba   :  { %v1559_v6 = vpop.f32.mrb[99].mxu1 }
 0x1bb   :  { %v1555_v8 = vadd.f32 %v1554_v25, %v1394_v23  ;;  %v1397_v24 = vadd.f32 %v2436_v3, %v3835_v45  ;;  %2566 = vmatmul.mubr.bf16.gmra.mrb[140].mxu0 %v1656_v32 }
 0x1bd   :  { %v1558_v40 = vadd.f32 %v1557_v0, %v1397_v24  ;;  %v2437_v12 = vpop.f32.mrb[100].mxu0  ;;  %v1633_v49 = vmax.f32 %v1555_v8, 0.0 }
 0x1be   :  { %v2438_v14 = vpop.f32.mrb[101].mxu0 }
 0x1bf   :  { %v1562_v15 = vpop.f32.mrb[100].mxu1  ;;  %v1634_v44 = vmax.f32 %v1558_v40, 0.0  ;;  %v2439_v46 = vadd.f32 %v2438_v14, %v2437_v12  ;;  %v2440_v16 = vpop.f32.mrb[102].mxu0 }
 0x1c0   :  { %v1564_v18 = vpop.f32.mrb[101].mxu1  ;;  %v2441_v51 = vpop.f32.mrb[103].mxu0 }
 0x1c1   :  { %v1565_v52 = vpop.f32.mrb[102].mxu1  ;;  %v1657_v19 = vpack.c.bf16 %v1634_v44, %v1633_v49  ;;  %v1402_v43 = vadd.f32 %v2439_v46, %v3839_v1  ;;  %v2442_v20 = vadd.f32 %v2441_v51, %v2440_v16 }
 0x1c2   :  { %v1567_v53 = vpop.f32.mrb[103].mxu1 }
 0x1c3   :  { %v1563_v21 = vadd.f32 %v1562_v15, %v1402_v43  ;;  %v1405_v45 = vadd.f32 %v2442_v20, %v3841_v2  ;;  %2569 = vmatprep.mubr.bf16.mxu0 %v1657_v19 }
 0x1c5   :  { %v1566_v29 = vadd.f32 %v1565_v52, %v1405_v45  ;;  %v2443_v30 = vpop.f32.mrb[104].mxu0  ;;  %v1635_v7 = vmax.f32 %v1563_v21, 0.0 }
 0x1c6   :  { %v2444_v33 = vpop.f32.mrb[105].mxu0 }
 0x1c7   :  { %v1570_v36 = vpop.f32.mrb[104].mxu1  ;;  %v1636_v37 = vmax.f32 %v1566_v29, 0.0  ;;  %v2445_v38 = vadd.f32 %v2444_v33, %v2443_v30  ;;  %v2446_v39 = vpop.f32.mrb[106].mxu0 }
 0x1c8   :  { %v1572_v13 = vpop.f32.mrb[105].mxu1  ;;  %v2447_v41 = vpop.f32.mrb[107].mxu0 }
 0x1c9   :  { %v1573_v11 = vpop.f32.mrb[106].mxu1  ;;  %v1658_v4 = vpack.c.bf16 %v1636_v37, %v1635_v7  ;;  %v2448_v42 = vadd.f32 %v2447_v41, %v2446_v39  ;;  %v1410_v1 = vadd.f32 %v2445_v38, %v3845_v22 }
 0x1ca   :  { %v1575_v47 = vpop.f32.mrb[107].mxu1 }
 0x1cb   :  { %v1571_v54 = vadd.f32 %v1570_v36, %v1410_v1  ;;  %2570 = vmatmul.mubr.bf16.gmra.mrb[144].mxu0 %v1658_v4  ;;  %v1413_v2 = vadd.f32 %v2448_v42, %v3847_v26 }
 0x1cd   :  { %v1574_v5 = vadd.f32 %v1573_v11, %v1413_v2  ;;  %v2449_v17 = vpop.f32.mrb[108].mxu0  ;;  %v1637_v25 = vmax.f32 %v1571_v54, 0.0 }
 0x1ce   :  { %v2450_v55 = vpop.f32.mrb[109].mxu0 }
 0x1cf   :  { %v1578_v56 = vpop.f32.mrb[108].mxu1  ;;  %v1638_v57 = vmax.f32 %v1574_v5, 0.0  ;;  %v2451_v58 = vadd.f32 %v2450_v55, %v2449_v17  ;;  %v2452_v59 = vpop.f32.mrb[110].mxu0 }
 0x1d0   :  { %v1580_v31 = vpop.f32.mrb[109].mxu1  ;;  %v2453_v60 = vpop.f32.mrb[111].mxu0 }
 0x1d1   :  { %v1581_v63 = vpop.f32.mrb[110].mxu1  ;;  %v1659_v0 = vpack.c.bf16 %v1638_v57, %v1637_v25  ;;  %v2454_v32 = vadd.f32 %v2453_v60, %v2452_v59  ;;  %v1418_v22 = vadd.f32 %v2451_v58, %v3851_v48 }
 0x1d2   :  { %v1583_v23 = vpop.f32.mrb[111].mxu1 }
 0x1d3   :  { %v1579_v3 = vadd.f32 %v1578_v56, %v1418_v22  ;;  %2573 = vmatprep.mubr.bf16.mxu0 %v1659_v0  ;;  %v1421_v26 = vadd.f32 %v2454_v32, %v3853_v50 }
 0x1d5   :  { %v1582_v6 = vadd.f32 %v1581_v63, %v1421_v26  ;;  %v2455_v8 = vpop.f32.mrb[112].mxu0  ;;  %v1639_v12 = vmax.f32 %v1579_v3, 0.0 }
 0x1d6   :  { %v2456_v24 = vpop.f32.mrb[113].mxu0 }
 0x1d7   :  { %v1586_v40 = vpop.f32.mrb[112].mxu1  ;;  %v1640_v14 = vmax.f32 %v1582_v6, 0.0  ;;  %v2457_v15 = vadd.f32 %v2456_v24, %v2455_v8  ;;  %v2458_v49 = vpop.f32.mrb[114].mxu0 }
 0x1d8   :  { %v1588_v44 = vpop.f32.mrb[113].mxu1  ;;  %v2459_v46 = vpop.f32.mrb[115].mxu0 }
 0x1d9   :  { %v1589_v16 = vpop.f32.mrb[114].mxu1  ;;  %v1660_v18 = vpack.c.bf16 %v1640_v14, %v1639_v12  ;;  %v2460_v51 = vadd.f32 %v2459_v46, %v2458_v49  ;;  %v1426_v48 = vadd.f32 %v2457_v15, %v3857_v9 }
 0x1da   :  { %v1591_v52 = vpop.f32.mrb[115].mxu1 }
 0x1db   :  { %v1587_v19 = vadd.f32 %v1586_v40, %v1426_v48  ;;  %2574 = vmatmul.mubr.bf16.gmra.mrb[148].mxu0 %v1660_v18  ;;  %v1429_v50 = vadd.f32 %v2460_v51, %v3859_v10 }
 0x1dd   :  { %v1590_v43 = vadd.f32 %v1589_v16, %v1429_v50  ;;  %v2461_v20 = vpop.f32.mrb[116].mxu0  ;;  %v1641_v45 = vmax.f32 %v1587_v19, 0.0  ;;  %v3914_v16 = vld [vmem:[%s3992_s4] ss:$0 sm:$0xff] }
 0x1de   :  { %v2462_v53 = vpop.f32.mrb[117].mxu0  ;;  %v3922_v50 = vld [vmem:[%s3993_s5] sm:$0x1] }
 0x1df   :  { %v1594_v21 = vpop.f32.mrb[116].mxu1  ;;  %v1642_v29 = vmax.f32 %v1590_v43, 0.0  ;;  %v2463_v30 = vadd.f32 %v2462_v53, %v2461_v20  ;;  %v2464_v33 = vpop.f32.mrb[118].mxu0  ;;  %2535 = vmatprep.mubr.f32.mxu1 %v3922_v50 }
 0x1e0   :  { %v1596_v36 = vpop.f32.mrb[117].mxu1  ;;  %v2465_v7 = vpop.f32.mrb[119].mxu0 }
 0x1e1   :  { %v1597_v37 = vpop.f32.mrb[118].mxu1  ;;  %v1661_v38 = vpack.c.bf16 %v1642_v29, %v1641_v45  ;;  %v2466_v39 = vadd.f32 %v2465_v7, %v2464_v33  ;;  %v1434_v9 = vadd.f32 %v2463_v30, %v3863_v34 }
 0x1e2   :  { %v1599_v13 = vpop.f32.mrb[119].mxu1 }
 0x1e3   :  { %v1595_v41 = vadd.f32 %v1594_v21, %v1434_v9  ;;  %2577 = vmatprep.mubr.bf16.mxu0 %v1661_v38  ;;  %v1437_v10 = vadd.f32 %v2466_v39, %v3865_v35 }
 0x1e5   :  { %v1598_v11 = vadd.f32 %v1597_v37, %v1437_v10  ;;  %v2467_v4 = vpop.f32.mrb[120].mxu0  ;;  %v1643_v47 = vmax.f32 %v1595_v41, 0.0 }
 0x1e6   :  { %v2468_v42 = vpop.f32.mrb[121].mxu0 }
 0x1e7   :  { %v1602_v1 = vpop.f32.mrb[120].mxu1  ;;  %v1644_v54 = vmax.f32 %v1598_v11, 0.0  ;;  %v2469_v2 = vadd.f32 %v2468_v42, %v2467_v4  ;;  %v2470_v5 = vpop.f32.mrb[122].mxu0 }
 0x1e8   :  { %v1604_v17 = vpop.f32.mrb[121].mxu1  ;;  %v2471_v55 = vpop.f32.mrb[123].mxu0 }
 0x1e9   :  { %v1605_v56 = vpop.f32.mrb[122].mxu1  ;;  %v1662_v25 = vpack.c.bf16 %v1644_v54, %v1643_v47  ;;  %v2472_v57 = vadd.f32 %v2471_v55, %v2470_v5  ;;  %v1442_v34 = vadd.f32 %v2469_v2, %v3869_v61 }
 0x1ea   :  { %v1607_v58 = vpop.f32.mrb[123].mxu1 }
 0x1eb   :  { %v1603_v59 = vadd.f32 %v1602_v1, %v1442_v34  ;;  %2578 = vmatmul.mubr.bf16.gmra.mrb[152].mxu0 %v1662_v25  ;;  %v1445_v35 = vadd.f32 %v2472_v57, %v3871_v62 }
 0x1ed   :  { %v1606_v31 = vadd.f32 %v1605_v56, %v1445_v35  ;;  %v2473_v60 = vpop.f32.mrb[124].mxu0  ;;  %v1645_v32 = vmax.f32 %v1603_v59, 0.0 }
 0x1ee   :  { %v2474_v63 = vpop.f32.mrb[125].mxu0 }
 0x1ef   :  { %v1610_v0 = vpop.f32.mrb[124].mxu1  ;;  %v1646_v22 = vmax.f32 %v1606_v31, 0.0  ;;  %v2475_v23 = vadd.f32 %v2474_v63, %v2473_v60  ;;  %v2476_v3 = vpop.f32.mrb[126].mxu0 }
 0x1f0   :  { %v1612_v26 = vpop.f32.mrb[125].mxu1  ;;  %v2477_v6 = vpop.f32.mrb[127].mxu0 }
 0x1f1   :  { %v1613_v8 = vpop.f32.mrb[126].mxu1  ;;  %v1663_v24 = vpack.c.bf16 %v1646_v22, %v1645_v32  ;;  %v2478_v40 = vadd.f32 %v2477_v6, %v2476_v3  ;;  %v1450_v61 = vadd.f32 %v2475_v23, %v3875_v27 }
 0x1f2   :  { %v1615_v12 = vpop.f32.mrb[127].mxu1 }
 0x1f3   :  { %v1611_v14 = vadd.f32 %v1610_v0, %v1450_v61  ;;  %2581 = vmatprep.mubr.bf16.mxu0 %v1663_v24  ;;  %v1453_v62 = vadd.f32 %v2478_v40, %v3877_v28 }
 0x1f5   :  { %v1614_v15 = vadd.f32 %v1613_v8, %v1453_v62  ;;  %v1647_v49 = vmax.f32 %v1611_v14, 0.0 }
 0x1f7   :  { %v1648_v44 = vmax.f32 %v1614_v15, 0.0 }
 0x1f9   :  { %v1664_v46 = vpack.c.bf16 %v1648_v44, %v1647_v49 }
 0x1fb   :  { %2582 = vmatmul.mubr.bf16.gmra.mrb[156].mxu0 %v1664_v46 }
 0x25e   :  { %v2555_v18 = vpop.f32.mrb[128].mxu0 }
 0x25f   :  { %v1779_v51 = vadd.f32 %v2555_v18, %v3914_v16  ;;  %v1770_v48 = vpop.f32.mrb[129].mxu0 }
 0x260   :  { %v1771_v27 = vadd.f32 %v3914_v16, %v1770_v48  ;;  %v2556_v52 = vpop.f32.mrb[130].mxu0 }
 0x261   :  { %v1782_v19 = vadd.f32 %v2556_v52, %v3914_v16  ;;  %v1773_v28 = vpop.f32.mrb[131].mxu0  ;;  %v1899_v20 = vmax.f32 %v1779_v51, 0.0 }
 0x262   :  { %v1774_v43 = vadd.f32 %v3914_v16, %v1773_v28  ;;  %v1897_v21 = vmax.f32 %v1771_v27, 0.0 }
 0x263   :  { %v1900_v53 = vmax.f32 %v1782_v19, 0.0 }
 0x264   :  { %v1898_v45 = vmax.f32 %v1774_v43, 0.0 }
 0x265   :  { %v3926_v29 = vpack.c.bf16 %v1900_v53, %v1899_v20 }
 0x266   :  { %v2587_v30 = vpack.c.bf16 %v1898_v45, %v1897_v21 }
 0x26e   :  { %v2559_v33 = vpop.f32.mrb[132].mxu0 }
 0x26f   :  { %v1795_v36 = vadd.f32 %v2559_v33, %v3914_v16  ;;  %v1786_v7 = vpop.f32.mrb[133].mxu0 }
 0x270   :  { %v1787_v37 = vadd.f32 %v3914_v16, %v1786_v7  ;;  %v2560_v38 = vpop.f32.mrb[134].mxu0 }
 0x271   :  { %v1798_v39 = vadd.f32 %v2560_v38, %v3914_v16  ;;  %v1789_v9 = vpop.f32.mrb[135].mxu0  ;;  %v1903_v41 = vmax.f32 %v1795_v36, 0.0 }
 0x272   :  { %v1790_v13 = vadd.f32 %v3914_v16, %v1789_v9  ;;  %v1901_v11 = vmax.f32 %v1787_v37, 0.0 }
 0x273   :  { %v1904_v10 = vmax.f32 %v1798_v39, 0.0 }
 0x274   :  { %v1902_v4 = vmax.f32 %v1790_v13, 0.0 }
 0x275   :  { %v3932_v42 = vpack.c.bf16 %v1904_v10, %v1903_v41 }
 0x276   :  { %v2595_v1 = vpack.c.bf16 %v1902_v4, %v1901_v11 }
 0x27e   :  { %v2563_v47 = vpop.f32.mrb[136].mxu0 }
 0x27f   :  { %v1811_v54 = vadd.f32 %v2563_v47, %v3914_v16  ;;  %v1802_v2 = vpop.f32.mrb[137].mxu0 }
 0x280   :  { %v1803_v5 = vadd.f32 %v3914_v16, %v1802_v2  ;;  %v2564_v17 = vpop.f32.mrb[138].mxu0 }
 0x281   :  { %v1814_v55 = vadd.f32 %v2564_v17, %v3914_v16  ;;  %v1805_v56 = vpop.f32.mrb[139].mxu0  ;;  %v1907_v57 = vmax.f32 %v1811_v54, 0.0 }
 0x282   :  { %v1806_v25 = vadd.f32 %v3914_v16, %v1805_v56  ;;  %v1905_v58 = vmax.f32 %v1803_v5, 0.0 }
 0x283   :  { %v1908_v34 = vmax.f32 %v1814_v55, 0.0 }
 0x284   :  { %v1906_v59 = vmax.f32 %v1806_v25, 0.0 }
 0x285   :  { %v3938_v35 = vpack.c.bf16 %v1908_v34, %v1907_v57 }
 0x286   :  { %v3940_v31 = vpack.c.bf16 %v1906_v59, %v1905_v58 }
 0x28e   :  { %v2567_v60 = vpop.f32.mrb[140].mxu0 }
 0x28f   :  { %v1827_v63 = vadd.f32 %v2567_v60, %v3914_v16  ;;  %v1818_v0 = vpop.f32.mrb[141].mxu0 }
 0x290   :  { %v1819_v32 = vadd.f32 %v3914_v16, %v1818_v0  ;;  %v2568_v22 = vpop.f32.mrb[142].mxu0 }
 0x291   :  { %v1830_v23 = vadd.f32 %v2568_v22, %v3914_v16  ;;  %v1821_v3 = vpop.f32.mrb[143].mxu0  ;;  %v1911_v6 = vmax.f32 %v1827_v63, 0.0 }
 0x292   :  { %v1822_v26 = vadd.f32 %v3914_v16, %v1821_v3  ;;  %v1909_v24 = vmax.f32 %v1819_v32, 0.0 }
 0x293   :  { %v1912_v8 = vmax.f32 %v1830_v23, 0.0 }
 0x294   :  { %v1910_v40 = vmax.f32 %v1822_v26, 0.0 }
 0x295   :  { %v3946_v61 = vpack.c.bf16 %v1912_v8, %v1911_v6 }
 0x296   :  { %v3948_v12 = vpack.c.bf16 %v1910_v40, %v1909_v24 }
 0x29e   :  { %v2571_v14 = vpop.f32.mrb[144].mxu0 }
 0x29f   :  { %v1843_v62 = vadd.f32 %v2571_v14, %v3914_v16  ;;  %v1834_v15 = vpop.f32.mrb[145].mxu0 }
 0x2a0   :  { %v1835_v49 = vadd.f32 %v3914_v16, %v1834_v15  ;;  %v2572_v44 = vpop.f32.mrb[146].mxu0 }
 0x2a1   :  { %v1846_v46 = vadd.f32 %v2572_v44, %v3914_v16  ;;  %v1837_v18 = vpop.f32.mrb[147].mxu0  ;;  %v1915_v48 = vmax.f32 %v1843_v62, 0.0 }
 0x2a2   :  { %v1838_v51 = vadd.f32 %v3914_v16, %v1837_v18  ;;  %v1913_v52 = vmax.f32 %v1835_v49, 0.0 }
 0x2a3   :  { %v1916_v27 = vmax.f32 %v1846_v46, 0.0  ;;  %v2021_v46 = vlaneseq }
 0x2a4   :  { %v1914_v19 = vmax.f32 %v1838_v51, 0.0 }
 0x2a5   :  { %v2589_v28 = vpack.c.bf16 %v1916_v27, %v1915_v48  ;;  %v2022_v51 = vshrl.u32 %v2021_v46, 7  ;;  %vm2035_vm2 = vcmp.lt.s32.totalorder %v2021_v46, 256 }
 0x2a6   :  { %v2585_v43 = vpack.c.bf16 %v1914_v19, %v1913_v52 }
 0x2a8   :  { %2586 = vmatprep.subr.bf16.mxu1 %v2585_v43 }
 0x2a9   :  { %2588 = vmatpush3.bf16.xpose.msra.mxu1 %v2587_v30 }
 0x2aa   :  { %2590 = vmatprep.subr.bf16.mxu1 %v2589_v28 }
 0x2ae   :  { %v2575_v20 = vpop.f32.mrb[148].mxu0 }
 0x2af   :  { %v1859_v53 = vadd.f32 %v2575_v20, %v3914_v16  ;;  %v1850_v21 = vpop.f32.mrb[149].mxu0 }
 0x2b0   :  { %v1851_v45 = vadd.f32 %v3914_v16, %v1850_v21  ;;  %v2576_v33 = vpop.f32.mrb[150].mxu0 }
 0x2b1   :  { %v1862_v36 = vadd.f32 %v2576_v33, %v3914_v16  ;;  %v1853_v7 = vpop.f32.mrb[151].mxu0  ;;  %2592 = vmatpush3.bf16.xpose.msra.mxu1 %v3926_v29  ;;  %v1919_v38 = vmax.f32 %v1859_v53, 0.0 }
 0x2b2   :  { %v1854_v37 = vadd.f32 %v3914_v16, %v1853_v7  ;;  %v1917_v9 = vmax.f32 %v1851_v45, 0.0 }
 0x2b3   :  { %v1920_v39 = vmax.f32 %v1862_v36, 0.0 }
 0x2b4   :  { %v1918_v13 = vmax.f32 %v1854_v37, 0.0 }
 0x2b5   :  { %v2597_v30 = vpack.c.bf16 %v1920_v39, %v1919_v38 }
 0x2b6   :  { %v2593_v41 = vpack.c.bf16 %v1918_v13, %v1917_v9 }
 0x2b8   :  { %2594 = vmatprep.subr.bf16.mxu1 %v2593_v41 }
 0x2b9   :  { %2596 = vmatpush3.bf16.xpose.msra.mxu1 %v2595_v1 }
 0x2ba   :  { %2598 = vmatprep.subr.bf16.mxu1 %v2597_v30 }
 0x2be   :  { %v2579_v10 = vpop.f32.mrb[152].mxu0 }
 0x2bf   :  { %v1875_v11 = vadd.f32 %v2579_v10, %v3914_v16  ;;  %v1866_v4 = vpop.f32.mrb[153].mxu0 }
 0x2c0   :  { %v1867_v47 = vadd.f32 %v3914_v16, %v1866_v4  ;;  %v2580_v54 = vpop.f32.mrb[154].mxu0 }
 0x2c1   :  { %v1878_v29 = vadd.f32 %v2580_v54, %v3914_v16  ;;  %v1869_v2 = vpop.f32.mrb[155].mxu0  ;;  %2600 = vmatpush3.bf16.xpose.msra.mxu1 %v3932_v42  ;;  %v1923_v17 = vmax.f32 %v1875_v11, 0.0 }
 0x2c2   :  { %v1870_v5 = vadd.f32 %v3914_v16, %v1869_v2  ;;  %v1921_v56 = vmax.f32 %v1867_v47, 0.0 }
 0x2c3   :  { %v1924_v55 = vmax.f32 %v1878_v29, 0.0 }
 0x2c4   :  { %v1922_v25 = vmax.f32 %v1870_v5, 0.0 }
 0x2c5   :  { %v2605_v1 = vpack.c.bf16 %v1924_v55, %v1923_v17 }
 0x2c6   :  { %v2601_v57 = vpack.c.bf16 %v1922_v25, %v1921_v56 }
 0x2c8   :  { %2602 = vmatprep.subr.bf16.mxu1 %v2601_v57 }
 0x2c9   :  { %2604 = vmatpush3.bf16.xpose.msra.mxu1 %v3940_v31 }
 0x2ca   :  { %2606 = vmatprep.subr.bf16.mxu1 %v2605_v1 }
 0x2ce   :  { %v2583_v34 = vpop.f32.mrb[156].mxu0 }
 0x2cf   :  { %v1891_v58 = vadd.f32 %v2583_v34, %v3914_v16  ;;  %v1882_v59 = vpop.f32.mrb[157].mxu0 }
 0x2d0   :  { %v1883_v60 = vadd.f32 %v3914_v16, %v1882_v59  ;;  %v2584_v63 = vpop.f32.mrb[158].mxu0 }
 0x2d1   :  { %v1894_v42 = vadd.f32 %v2584_v63, %v3914_v16  ;;  %v1885_v0 = vpop.f32.mrb[159].mxu0  ;;  %2608 = vmatpush3.bf16.xpose.msra.mxu1 %v3938_v35  ;;  %v1927_v22 = vmax.f32 %v1891_v58, 0.0  ;;  %v1931_v35 = vstv %s3994_s6  ;;  %s2725_s6 = smov [#allocation3]  }
 0x2d2   :  { %v1886_v32 = vadd.f32 %v3914_v16, %v1885_v0  ;;  %v1925_v3 = vmax.f32 %v1883_v60, 0.0  ;;  %s2044_s19 = sshll.u32 %s2725_s6, 4  ;;  %s2045_s19 = int_to_ptr.vmem [resolvable:$true] %s2044_s19 }
 0x2d3   :  { %v1928_v23 = vmax.f32 %v1894_v42, 0.0  ;;  %s2699_s20 = scalar_lea.vmem %s2045_s19, 32  ;;  %p2704_p1 = scmp.lt.s32.totalorder %s2045_s19, %s2045_s19 }
 0x2d4   :  { %v1926_v26 = vmax.f32 %v1886_v32, 0.0  ;;  %p2700_p0 = scmp.ne.s32.totalorder %s2045_s19, %s2699_s20  ;;  %p2705_p2 = scmp.lt.s32.totalorder %s2699_s20, %s2699_s20 }
 0x2d5   :  { %v2613_v31 = vpack.c.bf16 %v1928_v23, %v1927_v22 }
 0x2d6   :  { %v2609_v6 = vpack.c.bf16 %v1926_v26, %v1925_v3  ;;  %p2706_p3 = por %p2705_p2, %p2704_p1 }
 0x2d8   :  { %2610 = vmatprep.subr.bf16.mxu1 %v2609_v6  ;;  %p2707_p4 = pnand %p2706_p3, %p2700_p0 }
 0x2d9   :  { %2612 = vmatpush3.bf16.xpose.msra.mxu1 %v3948_v12 }
 0x2da   :  { %2614 = vmatprep.subr.bf16.mxu1 %v2613_v31 }
 0x2e1   :  { %2616 = vmatpush3.bf16.xpose.msra.mxu1 %v3946_v61  ;;  %v2724_v61 = vmov 1966171168  }
 0x2e8   :  { %2536 = vmatmul.mubr.f32.vlgmr.msra.gmra.mrb[128].mxu1 %v3922_v50  ;;  %v2019_v50 = vunpack.c.l.s4 %v2724_v61 }
 0x2ea   :  { %v2020_v18 = vunpack.c.0.s8 %v2019_v50 }
 0x2ec   :  { %v2023_v27 = vsub.s32 %v2020_v18, %v2022_v51 }
 0x3bb   :  { %v1998_v8 = vpop.f32.mrb[128].mxu1 }
 0x3bc   :  { %v1999_v16 = vadd.f32 %v1998_v8, %v1931_v35  ;;  %v2000_v24 = vpop.f32.mrb[129].mxu1 }
 0x3bd   :  { %v2001_v40 = vadd.f32 %v2000_v24, %v1931_v35 }
 0x3be   :  { %v2141_v14 = vmul.f32 -1.442695, %v1999_v16 }
 0x3bf   :  { %v2142_v62 = vmul.f32 -1.442695, %v2001_v40 }
 0x3c0   :  { %2691 = vpow2.f32 %v2141_v14 }
 0x3c1   :  { %2693 = vpow2.f32 %v2142_v62 }
 0x3ca   :  { %v2692_v15 = vpop.eup %2691 }
 0x3cb   :  { %v2694_v49 = vpop.eup %2693  ;;  %v2009_v12 = vadd.f32 1.0, %v2692_v15 }
 0x3cc   :  { %v2010_v44 = vadd.f32 1.0, %v2694_v49 }
 0x3cd   :  { %2695 = vrcp.f32 %v2009_v12 }
 0x3ce   :  { %2697 = vrcp.f32 %v2010_v44 }
 0x3d7   :  { %v2696_v48 = vpop.eup %2695 }
 0x3d8   :  { %v2698_v52 = vpop.eup %2697 }
 0x3d9   :  { %v2017_v19 = vcombine.low %v2696_v48, %v2698_v52 }
 0x3db   :  { %v2024_v28 = vrot.slane %v2017_v19, %v2023_v27 }
 0x3dd   :  { %v2031_v43 = vrot.slane %v2024_v28, %v2023_v27 }
 0x3df   :  { %2037 = vst.msk [vmem:[#allocation3] sm:$0x3] %vm2035_vm2, %v2031_v43 }
 0x3e0   :  { %2710 = shalt.err (!%p2707_p4)
}
 0x3e1   :  { %s2711_s23 = scalar_lea.hbm %s3995_s7, 32 }
 0x3e2   :  { %p2712_p5 = scmp.ne.s32.totalorder %s3995_s7, %s2711_s23  ;;  %p2715_p6 = scmp.lt.u32.totalorder %s2711_s23, %s3995_s7 }
 0x3e4   :  { %p2717_p7 = pnand %p2715_p6, %p2712_p5 }
 0x3e6   :  { %2720 = shalt.err (!%p2717_p7)
}
 0x3e7   :  { %2047 = dma.vmem_to_hbm [thread:$0]  %s2045_s19, 32, %s3995_s7, [#allocation4]  }
 0x3e8   :  { %2721 = dma.done.wait [#allocation4], 32  }
 0x3e9   :  { %2722 = vsyncadd [#allocation4], 4294967264 }
 0x3ea   :  { %2051 = vsyncpa [#allocation4], 1 }

</bundles_post_ra>
